<compile_context>
chip_gen: v5e
topology: v5e:2x2
jax: 0.10.0
libtpu: 0.0.40
codegen_flags: <defaults>
</compile_context>

<pallas_src>
import functools
import math

import jax
import jax.numpy as jnp
from jax.experimental import pallas as pl

# ----------------------------- model config ---------------------------------
VOCAB = 100
MAX_POS = 16
D = 32          # hidden size
H = 2           # attention heads
F = 64          # FFN intermediate size
NUM_LAYERS = 2
B = 2           # batch
S = 8           # sequence length
LN_EPS = 1e-12
VEC_ROWS_PER_LAYER = 10   # bq, bk, bv, bo, b1, b2, ln1g, ln1b, ln2g, ln2b


# ------------------------------ kernel helpers -------------------------------
def _layernorm(x, gamma, beta):
    mu = jnp.mean(x, axis=-1, keepdims=True)
    var = jnp.mean((x - mu) ** 2, axis=-1, keepdims=True)
    return (x - mu) * jax.lax.rsqrt(var + LN_EPS) * gamma + beta


def _gelu(x):
    # tanh approximation of GELU (EUP-friendly); f32 throughout.
    return 0.5 * x * (1.0 + jnp.tanh(0.7978845608028654 * (x + 0.044715 * x * x * x)))


# ------------------------------ fused Pallas kernel --------------------------
def fused_encoder_kernel(num_layers, num_heads, avg_pool, batch, seq,
                         x_ref, mask_ref, wqkvo_ref, w1_ref, w2_ref, vecs_ref,
                         o_ref):
    # Single invocation: all weights + the whole (B*S, D) activation are VMEM
    # resident; nothing round-trips to HBM.
    x = x_ref[...]                           # (B*S, D) f32 word+pos embeddings
    d = x.shape[-1]
    dh = d // num_heads
    f_dim = w1_ref.shape[-1]

    def vec(row, width):
        # One f32 parameter vector (bias / LN) from the packed slab, (1, width).
        return vecs_ref[row:row + 1, 0:width]

    def dense(a_f32, w_bf16, b_f32):
        # bf16 MXU inputs, f32 accumulation, f32 bias add.
        return jnp.dot(a_f32.astype(jnp.bfloat16), w_bf16,
                       preferred_element_type=jnp.float32) + b_f32

    # Per-batch additive attention-mask rows, read once.
    mask_rows = [mask_ref[b:b + 1, :] for b in range(batch)]   # each (1, S)

    # embedding LayerNorm
    h = _layernorm(x, vec(0, d), vec(1, d))

    for li in range(num_layers):
        base = 2 + li * VEC_ROWS_PER_LAYER
        wq = wqkvo_ref[4 * li + 0]           # (D, D) bf16, 1/sqrt(dh) pre-folded
        wk = wqkvo_ref[4 * li + 1]
        wv = wqkvo_ref[4 * li + 2]
        wo = wqkvo_ref[4 * li + 3]
        w1 = w1_ref[li]                      # (D, F) bf16
        w2 = w2_ref[li]                      # (F, D) bf16

        # ---- self-attention projections (batch folded into M dim) ----
        q = dense(h, wq, vec(base + 0, d))   # (B*S, D) f32, already scaled
        k = dense(h, wk, vec(base + 1, d))
        v = dense(h, wv, vec(base + 2, d))
        q_bf = q.astype(jnp.bfloat16)
        k_bf = k.astype(jnp.bfloat16)
        v_bf = v.astype(jnp.bfloat16)

        # ---- per-batch / per-head attention; Wo folded per head so heads
        #      accumulate directly into (S, D) (no lane-axis concat) ----
        attn_rows = []
        for b in range(batch):
            rs = slice(b * seq, (b + 1) * seq)
            mb = mask_rows[b]
            acc = jnp.zeros((seq, d), jnp.float32)
            for hd in range(num_heads):
                cs = slice(hd * dh, (hd + 1) * dh)
                qh = q_bf[rs, cs]            # (S, dh) bf16
                kh = k_bf[rs, cs]
                vh = v_bf[rs, cs]
                # q . k^T without materializing the transpose
                s = jax.lax.dot_general(
                    qh, kh, (((1,), (1,)), ((), ())),
                    preferred_element_type=jnp.float32)          # (S, S) f32
                s = s + mb                                       # mask bias (f32)
                s = s - jnp.max(s, axis=-1, keepdims=True)
                p = jnp.exp(s)
                p = p * pl.reciprocal(jnp.sum(p, axis=-1, keepdims=True),
                                      approx=True)
                ctx = jnp.dot(p.astype(jnp.bfloat16), vh,
                              preferred_element_type=jnp.float32)  # (S, dh)
                acc = acc + jnp.dot(ctx.astype(jnp.bfloat16), wo[cs, :],
                                    preferred_element_type=jnp.float32)
            attn_rows.append(acc)
        attn = jnp.concatenate(attn_rows, axis=0) + vec(base + 3, d)  # (B*S, D)

        h1 = _layernorm(h + attn, vec(base + 6, d), vec(base + 7, d))

        # ---- feed-forward (batch folded into M dim) ----
        ff = _gelu(dense(h1, w1, vec(base + 4, f_dim)))
        ff = dense(ff, w2, vec(base + 5, d))
        h = _layernorm(h1 + ff, vec(base + 8, d), vec(base + 9, d))

    # ---- pooling (fused) ----
    if avg_pool:
        rows = [jnp.mean(h[b * seq:(b + 1) * seq, :], axis=0, keepdims=True)
                for b in range(batch)]                 # torch.mean(..., dim=1)
    else:
        rows = [h[b * seq:b * seq + 1, :] for b in range(batch)]  # [:, 0, :]
    o_ref[...] = jnp.concatenate(rows, axis=0)         # (B, D)


# ------------------------------ parameter init --------------------------------
def init_params(key):
    def normal(kk, shape, std=0.02):
        return std * jax.random.normal(kk, shape, dtype=jnp.float32)

    L = NUM_LAYERS
    dh = D // H
    scale = 1.0 / math.sqrt(dh)
    keys = jax.random.split(key, 8)

    # 1/sqrt(dh) folded into the query projection (weight AND bias) at init.
    wq = normal(keys[2], (L, D, D)) * scale
    wk = normal(keys[3], (L, D, D))
    wv = normal(keys[4], (L, D, D))
    wo = normal(keys[5], (L, D, D))
    # Packed bf16 slab: index 4*li + {0:q, 1:k, 2:v, 3:o}
    wqkvo = jnp.stack([wq, wk, wv, wo], axis=1).reshape(L * 4, D, D)
    wqkvo = wqkvo.astype(jnp.bfloat16)

    w1 = normal(keys[6], (L, D, F)).astype(jnp.bfloat16)
    w2 = normal(keys[7], (L, F, D)).astype(jnp.bfloat16)

    # Packed f32 vector slab: rows padded to F lanes (D-wide vectors in lanes
    # [0:D)).  Row 0/1 = embedding LN gamma/beta; per layer li, base 2+10*li:
    #   +0 bq (scale-folded), +1 bk, +2 bv, +3 bo, +4 b1(F), +5 b2,
    #   +6 ln1g, +7 ln1b, +8 ln2g, +9 ln2b
    def pad_row(v):
        return jnp.pad(v, (0, F - v.shape[0]))

    rows = [pad_row(jnp.ones((D,), jnp.float32)),
            pad_row(jnp.zeros((D,), jnp.float32))]
    for _ in range(L):
        rows += [pad_row(jnp.zeros((D,), jnp.float32) * scale)]   # bq (folded)
        rows += [pad_row(jnp.zeros((D,), jnp.float32))] * 3       # bk, bv, bo
        rows += [jnp.zeros((F,), jnp.float32)]                    # b1
        rows += [pad_row(jnp.zeros((D,), jnp.float32))]           # b2
        rows += [pad_row(jnp.ones((D,), jnp.float32)),
                 pad_row(jnp.zeros((D,), jnp.float32))]           # ln1 g/b
        rows += [pad_row(jnp.ones((D,), jnp.float32)),
                 pad_row(jnp.zeros((D,), jnp.float32))]           # ln2 g/b
    vecs = jnp.stack(rows, axis=0).astype(jnp.float32)            # (2+10L, F)

    return {
        "word_emb": normal(keys[0], (VOCAB, D)),
        "pos_emb": normal(keys[1], (MAX_POS, D)),
        "wqkvo": wqkvo,
        "w1": w1,
        "w2": w2,
        "vecs": vecs,
    }


# ------------------------------ forward wrapper --------------------------------
@functools.partial(jax.jit, static_argnames=("avg_pool",))
def text_encoder_forward(params, input_ids, attention_mask, avg_pool=False):
    bsz, seq = input_ids.shape

    # --- embedding gather (glue, plain JAX), flattened to (B*S, D) ---
    x = params["word_emb"][input_ids] + params["pos_emb"][:seq][None, :, :]
    x = x.reshape(bsz * seq, D).astype(jnp.float32)

    # additive attention-mask bias: (B, S), 0 for keep, -1e9 for pad (f32)
    mask_bias = (1.0 - attention_mask.astype(jnp.float32)) * -1e9

    # Single grid step (no grid): whole batch + all packed weights live in VMEM
    # for the entire fused forward pass.
    pooled = pl.pallas_call(
        functools.partial(fused_encoder_kernel, NUM_LAYERS, H, bool(avg_pool),
                          bsz, seq),
        out_shape=jax.ShapeDtypeStruct((bsz, D), jnp.float32),
    )(x, mask_bias, params["wqkvo"], params["w1"], params["w2"], params["vecs"])

    return pooled


# ------------------------------------ main -------------------------------------
if __name__ == "__main__":
    key = jax.random.PRNGKey(0)
    pkey, ikey = jax.random.split(key)

    params = init_params(pkey)

    input_ids = jax.random.randint(ikey, (B, S), 0, VOCAB, dtype=jnp.int32)
    attention_mask = jnp.ones((B, S), dtype=jnp.int32)
    attention_mask = attention_mask.at[1, -2:].set(0)   # pad the tail of example 1

    cls_out = text_encoder_forward(params, input_ids, attention_mask, avg_pool=False)
    avg_out = text_encoder_forward(params, input_ids, attention_mask, avg_pool=True)

    jax.block_until_ready(cls_out)
    jax.block_until_ready(avg_out)

    assert cls_out.shape == (B, D) and avg_out.shape == (B, D)
    assert jnp.all(jnp.isfinite(cls_out)) and jnp.all(jnp.isfinite(avg_out))
    print("KERNEL_OK")
</pallas_src>

<mosaic_0001>
module attributes {stable_mosaic.version = 11 : i64} {
  func.func @fused_encoder_kernel(%arg0: memref<16x32xf32, #tpu.memory_space<vmem>>, %arg1: memref<2x8xf32, #tpu.memory_space<vmem>>, %arg2: memref<8x32x32xbf16, #tpu.memory_space<vmem>>, %arg3: memref<2x32x64xbf16, #tpu.memory_space<vmem>>, %arg4: memref<2x64x32xbf16, #tpu.memory_space<vmem>>, %arg5: memref<22x64xf32, #tpu.memory_space<vmem>>, %arg6: memref<2x32xf32, #tpu.memory_space<vmem>>) attributes {dimension_semantics = [], scalar_prefetch = 0 : i64, scratch_operands = 0 : i64, tpu.core_type = #tpu.core_type<tc>} {
    %c0 = arith.constant 0 : index
    %c0_0 = arith.constant 0 : index
    %0 = vector.load %arg0[%c0, %c0_0] : memref<16x32xf32, #tpu.memory_space<vmem>>, vector<16x32xf32>
    %c0_1 = arith.constant 0 : index
    %c0_2 = arith.constant 0 : index
    %1 = vector.load %arg1[%c0_1, %c0_2] : memref<2x8xf32, #tpu.memory_space<vmem>>, vector<1x8xf32>
    %c1 = arith.constant 1 : index
    %c0_3 = arith.constant 0 : index
    %2 = vector.load %arg1[%c1, %c0_3] : memref<2x8xf32, #tpu.memory_space<vmem>>, vector<1x8xf32>
    %c0_4 = arith.constant 0 : index
    %c0_5 = arith.constant 0 : index
    %3 = vector.load %arg5[%c0_4, %c0_5] : memref<22x64xf32, #tpu.memory_space<vmem>>, vector<1x32xf32>
    %c1_6 = arith.constant 1 : index
    %c0_7 = arith.constant 0 : index
    %4 = vector.load %arg5[%c1_6, %c0_7] : memref<22x64xf32, #tpu.memory_space<vmem>>, vector<1x32xf32>
    %cst = arith.constant dense<0.000000e+00> : vector<16xf32>
    %5 = vector.multi_reduction <add>, %0, %cst [1] : vector<16x32xf32> to vector<16xf32>
    %6 = vector.shape_cast %5 : vector<16xf32> to vector<16x1xf32>
    %cst_8 = arith.constant 3.200000e+01 : f32
    %7 = vector.broadcast %cst_8 : f32 to vector<16x1xf32>
    %8 = arith.divf %6, %7 : vector<16x1xf32>
    %9 = vector.broadcast %8 : vector<16x1xf32> to vector<16x32xf32>
    %10 = arith.subf %0, %9 : vector<16x32xf32>
    %11 = arith.mulf %10, %10 : vector<16x32xf32>
    %cst_9 = arith.constant dense<0.000000e+00> : vector<16xf32>
    %12 = vector.multi_reduction <add>, %11, %cst_9 [1] : vector<16x32xf32> to vector<16xf32>
    %13 = vector.shape_cast %12 : vector<16xf32> to vector<16x1xf32>
    %cst_10 = arith.constant 3.200000e+01 : f32
    %14 = vector.broadcast %cst_10 : f32 to vector<16x1xf32>
    %15 = arith.divf %13, %14 : vector<16x1xf32>
    %16 = vector.broadcast %8 : vector<16x1xf32> to vector<16x32xf32>
    %17 = arith.subf %0, %16 : vector<16x32xf32>
    %cst_11 = arith.constant 9.99999996E-13 : f32
    %18 = vector.broadcast %cst_11 : f32 to vector<16x1xf32>
    %19 = arith.addf %15, %18 : vector<16x1xf32>
    %20 = math.rsqrt %19 : vector<16x1xf32>
    %21 = vector.broadcast %20 : vector<16x1xf32> to vector<16x32xf32>
    %22 = arith.mulf %17, %21 : vector<16x32xf32>
    %23 = vector.broadcast %3 : vector<1x32xf32> to vector<16x32xf32>
    %24 = arith.mulf %22, %23 : vector<16x32xf32>
    %25 = vector.broadcast %4 : vector<1x32xf32> to vector<16x32xf32>
    %26 = arith.addf %24, %25 : vector<16x32xf32>
    %c0_12 = arith.constant 0 : index
    %c0_13 = arith.constant 0 : index
    %c0_14 = arith.constant 0 : index
    %27 = vector.load %arg2[%c0_12, %c0_13, %c0_14] : memref<8x32x32xbf16, #tpu.memory_space<vmem>>, vector<1x32x32xbf16>
    %28 = vector.shape_cast %27 : vector<1x32x32xbf16> to vector<32x32xbf16>
    %c1_15 = arith.constant 1 : index
    %c0_16 = arith.constant 0 : index
    %c0_17 = arith.constant 0 : index
    %29 = vector.load %arg2[%c1_15, %c0_16, %c0_17] : memref<8x32x32xbf16, #tpu.memory_space<vmem>>, vector<1x32x32xbf16>
    %30 = vector.shape_cast %29 : vector<1x32x32xbf16> to vector<32x32xbf16>
    %c2 = arith.constant 2 : index
    %c0_18 = arith.constant 0 : index
    %c0_19 = arith.constant 0 : index
    %31 = vector.load %arg2[%c2, %c0_18, %c0_19] : memref<8x32x32xbf16, #tpu.memory_space<vmem>>, vector<1x32x32xbf16>
    %32 = vector.shape_cast %31 : vector<1x32x32xbf16> to vector<32x32xbf16>
    %c3 = arith.constant 3 : index
    %c0_20 = arith.constant 0 : index
    %c0_21 = arith.constant 0 : index
    %33 = vector.load %arg2[%c3, %c0_20, %c0_21] : memref<8x32x32xbf16, #tpu.memory_space<vmem>>, vector<1x32x32xbf16>
    %34 = vector.shape_cast %33 : vector<1x32x32xbf16> to vector<32x32xbf16>
    %c0_22 = arith.constant 0 : index
    %c0_23 = arith.constant 0 : index
    %c0_24 = arith.constant 0 : index
    %35 = vector.load %arg3[%c0_22, %c0_23, %c0_24] : memref<2x32x64xbf16, #tpu.memory_space<vmem>>, vector<1x32x64xbf16>
    %36 = vector.shape_cast %35 : vector<1x32x64xbf16> to vector<32x64xbf16>
    %c0_25 = arith.constant 0 : index
    %c0_26 = arith.constant 0 : index
    %c0_27 = arith.constant 0 : index
    %37 = vector.load %arg4[%c0_25, %c0_26, %c0_27] : memref<2x64x32xbf16, #tpu.memory_space<vmem>>, vector<1x64x32xbf16>
    %38 = vector.shape_cast %37 : vector<1x64x32xbf16> to vector<64x32xbf16>
    %c2_28 = arith.constant 2 : index
    %c0_29 = arith.constant 0 : index
    %39 = vector.load %arg5[%c2_28, %c0_29] : memref<22x64xf32, #tpu.memory_space<vmem>>, vector<1x32xf32>
    %40 = arith.truncf %26 : vector<16x32xf32> to vector<16x32xbf16>
    %cst_30 = arith.constant dense<0.000000e+00> : vector<16x32xf32>
    %41 = tpu.matmul %40, %28, %cst_30 {dimension_numbers = #tpu.dot_dimension_numbers<[1], [0], [0], [1], [0, 0, 1, 1], [], []>} : vector<16x32xbf16>, vector<32x32xbf16>, vector<16x32xf32> -> vector<16x32xf32>
    %42 = vector.broadcast %39 : vector<1x32xf32> to vector<16x32xf32>
    %43 = arith.addf %41, %42 : vector<16x32xf32>
    %c3_31 = arith.constant 3 : index
    %c0_32 = arith.constant 0 : index
    %44 = vector.load %arg5[%c3_31, %c0_32] : memref<22x64xf32, #tpu.memory_space<vmem>>, vector<1x32xf32>
    %45 = arith.truncf %26 : vector<16x32xf32> to vector<16x32xbf16>
    %cst_33 = arith.constant dense<0.000000e+00> : vector<16x32xf32>
    %46 = tpu.matmul %45, %30, %cst_33 {dimension_numbers = #tpu.dot_dimension_numbers<[1], [0], [0], [1], [0, 0, 1, 1], [], []>} : vector<16x32xbf16>, vector<32x32xbf16>, vector<16x32xf32> -> vector<16x32xf32>
    %47 = vector.broadcast %44 : vector<1x32xf32> to vector<16x32xf32>
    %48 = arith.addf %46, %47 : vector<16x32xf32>
    %c4 = arith.constant 4 : index
    %c0_34 = arith.constant 0 : index
    %49 = vector.load %arg5[%c4, %c0_34] : memref<22x64xf32, #tpu.memory_space<vmem>>, vector<1x32xf32>
    %50 = arith.truncf %26 : vector<16x32xf32> to vector<16x32xbf16>
    %cst_35 = arith.constant dense<0.000000e+00> : vector<16x32xf32>
    %51 = tpu.matmul %50, %32, %cst_35 {dimension_numbers = #tpu.dot_dimension_numbers<[1], [0], [0], [1], [0, 0, 1, 1], [], []>} : vector<16x32xbf16>, vector<32x32xbf16>, vector<16x32xf32> -> vector<16x32xf32>
    %52 = vector.broadcast %49 : vector<1x32xf32> to vector<16x32xf32>
    %53 = arith.addf %51, %52 : vector<16x32xf32>
    %54 = arith.truncf %43 : vector<16x32xf32> to vector<16x32xbf16>
    %55 = arith.truncf %48 : vector<16x32xf32> to vector<16x32xbf16>
    %56 = arith.truncf %53 : vector<16x32xf32> to vector<16x32xbf16>
    %cst_36 = arith.constant 0.000000e+00 : f32
    %57 = vector.broadcast %cst_36 : f32 to vector<8x32xf32>
    %58 = vector.extract_strided_slice %54 {offsets = [0, 0], sizes = [8, 16], strides = [1, 1]} : vector<16x32xbf16> to vector<8x16xbf16>
    %59 = vector.extract_strided_slice %55 {offsets = [0, 0], sizes = [8, 16], strides = [1, 1]} : vector<16x32xbf16> to vector<8x16xbf16>
    %60 = vector.extract_strided_slice %56 {offsets = [0, 0], sizes = [8, 16], strides = [1, 1]} : vector<16x32xbf16> to vector<8x16xbf16>
    %cst_37 = arith.constant dense<0.000000e+00> : vector<8x8xf32>
    %61 = tpu.matmul %58, %59, %cst_37 {dimension_numbers = #tpu.dot_dimension_numbers<[1], [1], [0], [0], [0, 0, 1, 0], [], []>} : vector<8x16xbf16>, vector<8x16xbf16>, vector<8x8xf32> -> vector<8x8xf32>
    %62 = vector.broadcast %1 : vector<1x8xf32> to vector<8x8xf32>
    %63 = arith.addf %61, %62 : vector<8x8xf32>
    %cst_38 = arith.constant dense<0xFF800000> : vector<8xf32>
    %64 = vector.multi_reduction <maximumf>, %63, %cst_38 [1] : vector<8x8xf32> to vector<8xf32>
    %65 = vector.shape_cast %64 : vector<8xf32> to vector<8x1xf32>
    %66 = vector.broadcast %65 : vector<8x1xf32> to vector<8x8xf32>
    %67 = arith.subf %63, %66 : vector<8x8xf32>
    %68 = math.exp %67 : vector<8x8xf32>
    %cst_39 = arith.constant dense<0.000000e+00> : vector<8xf32>
    %69 = vector.multi_reduction <add>, %68, %cst_39 [1] : vector<8x8xf32> to vector<8xf32>
    %70 = vector.shape_cast %69 : vector<8xf32> to vector<8x1xf32>
    %71 = tpu.reciprocal %70 {approx = true} : vector<8x1xf32> -> vector<8x1xf32>
    %72 = vector.broadcast %71 : vector<8x1xf32> to vector<8x8xf32>
    %73 = arith.mulf %68, %72 : vector<8x8xf32>
    %74 = arith.truncf %73 : vector<8x8xf32> to vector<8x8xbf16>
    %cst_40 = arith.constant dense<0.000000e+00> : vector<8x16xf32>
    %75 = tpu.matmul %74, %60, %cst_40 {dimension_numbers = #tpu.dot_dimension_numbers<[1], [0], [0], [1], [0, 0, 1, 1], [], []>} : vector<8x8xbf16>, vector<8x16xbf16>, vector<8x16xf32> -> vector<8x16xf32>
    %76 = arith.truncf %75 : vector<8x16xf32> to vector<8x16xbf16>
    %77 = vector.extract_strided_slice %34 {offsets = [0, 0], sizes = [16, 32], strides = [1, 1]} : vector<32x32xbf16> to vector<16x32xbf16>
    %cst_41 = arith.constant dense<0.000000e+00> : vector<8x32xf32>
    %78 = tpu.matmul %76, %77, %cst_41 {dimension_numbers = #tpu.dot_dimension_numbers<[1], [0], [0], [1], [0, 0, 1, 1], [], []>} : vector<8x16xbf16>, vector<16x32xbf16>, vector<8x32xf32> -> vector<8x32xf32>
    %79 = arith.addf %57, %78 : vector<8x32xf32>
    %80 = vector.extract_strided_slice %54 {offsets = [0, 16], sizes = [8, 16], strides = [1, 1]} : vector<16x32xbf16> to vector<8x16xbf16>
    %81 = vector.extract_strided_slice %55 {offsets = [0, 16], sizes = [8, 16], strides = [1, 1]} : vector<16x32xbf16> to vector<8x16xbf16>
    %82 = vector.extract_strided_slice %56 {offsets = [0, 16], sizes = [8, 16], strides = [1, 1]} : vector<16x32xbf16> to vector<8x16xbf16>
    %cst_42 = arith.constant dense<0.000000e+00> : vector<8x8xf32>
    %83 = tpu.matmul %80, %81, %cst_42 {dimension_numbers = #tpu.dot_dimension_numbers<[1], [1], [0], [0], [0, 0, 1, 0], [], []>} : vector<8x16xbf16>, vector<8x16xbf16>, vector<8x8xf32> -> vector<8x8xf32>
    %84 = vector.broadcast %1 : vector<1x8xf32> to vector<8x8xf32>
    %85 = arith.addf %83, %84 : vector<8x8xf32>
    %cst_43 = arith.constant dense<0xFF800000> : vector<8xf32>
    %86 = vector.multi_reduction <maximumf>, %85, %cst_43 [1] : vector<8x8xf32> to vector<8xf32>
    %87 = vector.shape_cast %86 : vector<8xf32> to vector<8x1xf32>
    %88 = vector.broadcast %87 : vector<8x1xf32> to vector<8x8xf32>
    %89 = arith.subf %85, %88 : vector<8x8xf32>
    %90 = math.exp %89 : vector<8x8xf32>
    %cst_44 = arith.constant dense<0.000000e+00> : vector<8xf32>
    %91 = vector.multi_reduction <add>, %90, %cst_44 [1] : vector<8x8xf32> to vector<8xf32>
    %92 = vector.shape_cast %91 : vector<8xf32> to vector<8x1xf32>
    %93 = tpu.reciprocal %92 {approx = true} : vector<8x1xf32> -> vector<8x1xf32>
    %94 = vector.broadcast %93 : vector<8x1xf32> to vector<8x8xf32>
    %95 = arith.mulf %90, %94 : vector<8x8xf32>
    %96 = arith.truncf %95 : vector<8x8xf32> to vector<8x8xbf16>
    %cst_45 = arith.constant dense<0.000000e+00> : vector<8x16xf32>
    %97 = tpu.matmul %96, %82, %cst_45 {dimension_numbers = #tpu.dot_dimension_numbers<[1], [0], [0], [1], [0, 0, 1, 1], [], []>} : vector<8x8xbf16>, vector<8x16xbf16>, vector<8x16xf32> -> vector<8x16xf32>
    %98 = arith.truncf %97 : vector<8x16xf32> to vector<8x16xbf16>
    %99 = vector.extract_strided_slice %34 {offsets = [16, 0], sizes = [16, 32], strides = [1, 1]} : vector<32x32xbf16> to vector<16x32xbf16>
    %cst_46 = arith.constant dense<0.000000e+00> : vector<8x32xf32>
    %100 = tpu.matmul %98, %99, %cst_46 {dimension_numbers = #tpu.dot_dimension_numbers<[1], [0], [0], [1], [0, 0, 1, 1], [], []>} : vector<8x16xbf16>, vector<16x32xbf16>, vector<8x32xf32> -> vector<8x32xf32>
    %101 = arith.addf %79, %100 : vector<8x32xf32>
    %cst_47 = arith.constant 0.000000e+00 : f32
    %102 = vector.broadcast %cst_47 : f32 to vector<8x32xf32>
    %103 = vector.extract_strided_slice %54 {offsets = [8, 0], sizes = [8, 16], strides = [1, 1]} : vector<16x32xbf16> to vector<8x16xbf16>
    %104 = vector.extract_strided_slice %55 {offsets = [8, 0], sizes = [8, 16], strides = [1, 1]} : vector<16x32xbf16> to vector<8x16xbf16>
    %105 = vector.extract_strided_slice %56 {offsets = [8, 0], sizes = [8, 16], strides = [1, 1]} : vector<16x32xbf16> to vector<8x16xbf16>
    %cst_48 = arith.constant dense<0.000000e+00> : vector<8x8xf32>
    %106 = tpu.matmul %103, %104, %cst_48 {dimension_numbers = #tpu.dot_dimension_numbers<[1], [1], [0], [0], [0, 0, 1, 0], [], []>} : vector<8x16xbf16>, vector<8x16xbf16>, vector<8x8xf32> -> vector<8x8xf32>
    %107 = vector.broadcast %2 : vector<1x8xf32> to vector<8x8xf32>
    %108 = arith.addf %106, %107 : vector<8x8xf32>
    %cst_49 = arith.constant dense<0xFF800000> : vector<8xf32>
    %109 = vector.multi_reduction <maximumf>, %108, %cst_49 [1] : vector<8x8xf32> to vector<8xf32>
    %110 = vector.shape_cast %109 : vector<8xf32> to vector<8x1xf32>
    %111 = vector.broadcast %110 : vector<8x1xf32> to vector<8x8xf32>
    %112 = arith.subf %108, %111 : vector<8x8xf32>
    %113 = math.exp %112 : vector<8x8xf32>
    %cst_50 = arith.constant dense<0.000000e+00> : vector<8xf32>
    %114 = vector.multi_reduction <add>, %113, %cst_50 [1] : vector<8x8xf32> to vector<8xf32>
    %115 = vector.shape_cast %114 : vector<8xf32> to vector<8x1xf32>
    %116 = tpu.reciprocal %115 {approx = true} : vector<8x1xf32> -> vector<8x1xf32>
    %117 = vector.broadcast %116 : vector<8x1xf32> to vector<8x8xf32>
    %118 = arith.mulf %113, %117 : vector<8x8xf32>
    %119 = arith.truncf %118 : vector<8x8xf32> to vector<8x8xbf16>
    %cst_51 = arith.constant dense<0.000000e+00> : vector<8x16xf32>
    %120 = tpu.matmul %119, %105, %cst_51 {dimension_numbers = #tpu.dot_dimension_numbers<[1], [0], [0], [1], [0, 0, 1, 1], [], []>} : vector<8x8xbf16>, vector<8x16xbf16>, vector<8x16xf32> -> vector<8x16xf32>
    %121 = arith.truncf %120 : vector<8x16xf32> to vector<8x16xbf16>
    %122 = vector.extract_strided_slice %34 {offsets = [0, 0], sizes = [16, 32], strides = [1, 1]} : vector<32x32xbf16> to vector<16x32xbf16>
    %cst_52 = arith.constant dense<0.000000e+00> : vector<8x32xf32>
    %123 = tpu.matmul %121, %122, %cst_52 {dimension_numbers = #tpu.dot_dimension_numbers<[1], [0], [0], [1], [0, 0, 1, 1], [], []>} : vector<8x16xbf16>, vector<16x32xbf16>, vector<8x32xf32> -> vector<8x32xf32>
    %124 = arith.addf %102, %123 : vector<8x32xf32>
    %125 = vector.extract_strided_slice %54 {offsets = [8, 16], sizes = [8, 16], strides = [1, 1]} : vector<16x32xbf16> to vector<8x16xbf16>
    %126 = vector.extract_strided_slice %55 {offsets = [8, 16], sizes = [8, 16], strides = [1, 1]} : vector<16x32xbf16> to vector<8x16xbf16>
    %127 = vector.extract_strided_slice %56 {offsets = [8, 16], sizes = [8, 16], strides = [1, 1]} : vector<16x32xbf16> to vector<8x16xbf16>
    %cst_53 = arith.constant dense<0.000000e+00> : vector<8x8xf32>
    %128 = tpu.matmul %125, %126, %cst_53 {dimension_numbers = #tpu.dot_dimension_numbers<[1], [1], [0], [0], [0, 0, 1, 0], [], []>} : vector<8x16xbf16>, vector<8x16xbf16>, vector<8x8xf32> -> vector<8x8xf32>
    %129 = vector.broadcast %2 : vector<1x8xf32> to vector<8x8xf32>
    %130 = arith.addf %128, %129 : vector<8x8xf32>
    %cst_54 = arith.constant dense<0xFF800000> : vector<8xf32>
    %131 = vector.multi_reduction <maximumf>, %130, %cst_54 [1] : vector<8x8xf32> to vector<8xf32>
    %132 = vector.shape_cast %131 : vector<8xf32> to vector<8x1xf32>
    %133 = vector.broadcast %132 : vector<8x1xf32> to vector<8x8xf32>
    %134 = arith.subf %130, %133 : vector<8x8xf32>
    %135 = math.exp %134 : vector<8x8xf32>
    %cst_55 = arith.constant dense<0.000000e+00> : vector<8xf32>
    %136 = vector.multi_reduction <add>, %135, %cst_55 [1] : vector<8x8xf32> to vector<8xf32>
    %137 = vector.shape_cast %136 : vector<8xf32> to vector<8x1xf32>
    %138 = tpu.reciprocal %137 {approx = true} : vector<8x1xf32> -> vector<8x1xf32>
    %139 = vector.broadcast %138 : vector<8x1xf32> to vector<8x8xf32>
    %140 = arith.mulf %135, %139 : vector<8x8xf32>
    %141 = arith.truncf %140 : vector<8x8xf32> to vector<8x8xbf16>
    %cst_56 = arith.constant dense<0.000000e+00> : vector<8x16xf32>
    %142 = tpu.matmul %141, %127, %cst_56 {dimension_numbers = #tpu.dot_dimension_numbers<[1], [0], [0], [1], [0, 0, 1, 1], [], []>} : vector<8x8xbf16>, vector<8x16xbf16>, vector<8x16xf32> -> vector<8x16xf32>
    %143 = arith.truncf %142 : vector<8x16xf32> to vector<8x16xbf16>
    %144 = vector.extract_strided_slice %34 {offsets = [16, 0], sizes = [16, 32], strides = [1, 1]} : vector<32x32xbf16> to vector<16x32xbf16>
    %cst_57 = arith.constant dense<0.000000e+00> : vector<8x32xf32>
    %145 = tpu.matmul %143, %144, %cst_57 {dimension_numbers = #tpu.dot_dimension_numbers<[1], [0], [0], [1], [0, 0, 1, 1], [], []>} : vector<8x16xbf16>, vector<16x32xbf16>, vector<8x32xf32> -> vector<8x32xf32>
    %146 = arith.addf %124, %145 : vector<8x32xf32>
    %147 = tpu.concatenate %101, %146 in 0 : vector<8x32xf32>, vector<8x32xf32> -> vector<16x32xf32>
    %c5 = arith.constant 5 : index
    %c0_58 = arith.constant 0 : index
    %148 = vector.load %arg5[%c5, %c0_58] : memref<22x64xf32, #tpu.memory_space<vmem>>, vector<1x32xf32>
    %149 = vector.broadcast %148 : vector<1x32xf32> to vector<16x32xf32>
    %150 = arith.addf %147, %149 : vector<16x32xf32>
    %151 = arith.addf %26, %150 : vector<16x32xf32>
    %c8 = arith.constant 8 : index
    %c0_59 = arith.constant 0 : index
    %152 = vector.load %arg5[%c8, %c0_59] : memref<22x64xf32, #tpu.memory_space<vmem>>, vector<1x32xf32>
    %c9 = arith.constant 9 : index
    %c0_60 = arith.constant 0 : index
    %153 = vector.load %arg5[%c9, %c0_60] : memref<22x64xf32, #tpu.memory_space<vmem>>, vector<1x32xf32>
    %cst_61 = arith.constant dense<0.000000e+00> : vector<16xf32>
    %154 = vector.multi_reduction <add>, %151, %cst_61 [1] : vector<16x32xf32> to vector<16xf32>
    %155 = vector.shape_cast %154 : vector<16xf32> to vector<16x1xf32>
    %cst_62 = arith.constant 3.200000e+01 : f32
    %156 = vector.broadcast %cst_62 : f32 to vector<16x1xf32>
    %157 = arith.divf %155, %156 : vector<16x1xf32>
    %158 = vector.broadcast %157 : vector<16x1xf32> to vector<16x32xf32>
    %159 = arith.subf %151, %158 : vector<16x32xf32>
    %160 = arith.mulf %159, %159 : vector<16x32xf32>
    %cst_63 = arith.constant dense<0.000000e+00> : vector<16xf32>
    %161 = vector.multi_reduction <add>, %160, %cst_63 [1] : vector<16x32xf32> to vector<16xf32>
    %162 = vector.shape_cast %161 : vector<16xf32> to vector<16x1xf32>
    %cst_64 = arith.constant 3.200000e+01 : f32
    %163 = vector.broadcast %cst_64 : f32 to vector<16x1xf32>
    %164 = arith.divf %162, %163 : vector<16x1xf32>
    %165 = vector.broadcast %157 : vector<16x1xf32> to vector<16x32xf32>
    %166 = arith.subf %151, %165 : vector<16x32xf32>
    %cst_65 = arith.constant 9.99999996E-13 : f32
    %167 = vector.broadcast %cst_65 : f32 to vector<16x1xf32>
    %168 = arith.addf %164, %167 : vector<16x1xf32>
    %169 = math.rsqrt %168 : vector<16x1xf32>
    %170 = vector.broadcast %169 : vector<16x1xf32> to vector<16x32xf32>
    %171 = arith.mulf %166, %170 : vector<16x32xf32>
    %172 = vector.broadcast %152 : vector<1x32xf32> to vector<16x32xf32>
    %173 = arith.mulf %171, %172 : vector<16x32xf32>
    %174 = vector.broadcast %153 : vector<1x32xf32> to vector<16x32xf32>
    %175 = arith.addf %173, %174 : vector<16x32xf32>
    %c6 = arith.constant 6 : index
    %c0_66 = arith.constant 0 : index
    %176 = vector.load %arg5[%c6, %c0_66] : memref<22x64xf32, #tpu.memory_space<vmem>>, vector<1x64xf32>
    %177 = arith.truncf %175 : vector<16x32xf32> to vector<16x32xbf16>
    %cst_67 = arith.constant dense<0.000000e+00> : vector<16x64xf32>
    %178 = tpu.matmul %177, %36, %cst_67 {dimension_numbers = #tpu.dot_dimension_numbers<[1], [0], [0], [1], [0, 0, 1, 1], [], []>} : vector<16x32xbf16>, vector<32x64xbf16>, vector<16x64xf32> -> vector<16x64xf32>
    %179 = vector.broadcast %176 : vector<1x64xf32> to vector<16x64xf32>
    %180 = arith.addf %178, %179 : vector<16x64xf32>
    %cst_68 = arith.constant 5.000000e-01 : f32
    %181 = vector.broadcast %cst_68 : f32 to vector<16x64xf32>
    %182 = arith.mulf %181, %180 : vector<16x64xf32>
    %cst_69 = arith.constant 4.471500e-02 : f32
    %183 = vector.broadcast %cst_69 : f32 to vector<16x64xf32>
    %184 = arith.mulf %183, %180 : vector<16x64xf32>
    %185 = arith.mulf %184, %180 : vector<16x64xf32>
    %186 = arith.mulf %185, %180 : vector<16x64xf32>
    %187 = arith.addf %180, %186 : vector<16x64xf32>
    %cst_70 = arith.constant 0.797884583 : f32
    %188 = vector.broadcast %cst_70 : f32 to vector<16x64xf32>
    %189 = arith.mulf %188, %187 : vector<16x64xf32>
    %190 = math.tanh %189 : vector<16x64xf32>
    %cst_71 = arith.constant 1.000000e+00 : f32
    %191 = vector.broadcast %cst_71 : f32 to vector<16x64xf32>
    %192 = arith.addf %191, %190 : vector<16x64xf32>
    %193 = arith.mulf %182, %192 : vector<16x64xf32>
    %c7 = arith.constant 7 : index
    %c0_72 = arith.constant 0 : index
    %194 = vector.load %arg5[%c7, %c0_72] : memref<22x64xf32, #tpu.memory_space<vmem>>, vector<1x32xf32>
    %195 = arith.truncf %193 : vector<16x64xf32> to vector<16x64xbf16>
    %cst_73 = arith.constant dense<0.000000e+00> : vector<16x32xf32>
    %196 = tpu.matmul %195, %38, %cst_73 {dimension_numbers = #tpu.dot_dimension_numbers<[1], [0], [0], [1], [0, 0, 1, 1], [], []>} : vector<16x64xbf16>, vector<64x32xbf16>, vector<16x32xf32> -> vector<16x32xf32>
    %197 = vector.broadcast %194 : vector<1x32xf32> to vector<16x32xf32>
    %198 = arith.addf %196, %197 : vector<16x32xf32>
    %199 = arith.addf %175, %198 : vector<16x32xf32>
    %c10 = arith.constant 10 : index
    %c0_74 = arith.constant 0 : index
    %200 = vector.load %arg5[%c10, %c0_74] : memref<22x64xf32, #tpu.memory_space<vmem>>, vector<1x32xf32>
    %c11 = arith.constant 11 : index
    %c0_75 = arith.constant 0 : index
    %201 = vector.load %arg5[%c11, %c0_75] : memref<22x64xf32, #tpu.memory_space<vmem>>, vector<1x32xf32>
    %cst_76 = arith.constant dense<0.000000e+00> : vector<16xf32>
    %202 = vector.multi_reduction <add>, %199, %cst_76 [1] : vector<16x32xf32> to vector<16xf32>
    %203 = vector.shape_cast %202 : vector<16xf32> to vector<16x1xf32>
    %cst_77 = arith.constant 3.200000e+01 : f32
    %204 = vector.broadcast %cst_77 : f32 to vector<16x1xf32>
    %205 = arith.divf %203, %204 : vector<16x1xf32>
    %206 = vector.broadcast %205 : vector<16x1xf32> to vector<16x32xf32>
    %207 = arith.subf %199, %206 : vector<16x32xf32>
    %208 = arith.mulf %207, %207 : vector<16x32xf32>
    %cst_78 = arith.constant dense<0.000000e+00> : vector<16xf32>
    %209 = vector.multi_reduction <add>, %208, %cst_78 [1] : vector<16x32xf32> to vector<16xf32>
    %210 = vector.shape_cast %209 : vector<16xf32> to vector<16x1xf32>
    %cst_79 = arith.constant 3.200000e+01 : f32
    %211 = vector.broadcast %cst_79 : f32 to vector<16x1xf32>
    %212 = arith.divf %210, %211 : vector<16x1xf32>
    %213 = vector.broadcast %205 : vector<16x1xf32> to vector<16x32xf32>
    %214 = arith.subf %199, %213 : vector<16x32xf32>
    %cst_80 = arith.constant 9.99999996E-13 : f32
    %215 = vector.broadcast %cst_80 : f32 to vector<16x1xf32>
    %216 = arith.addf %212, %215 : vector<16x1xf32>
    %217 = math.rsqrt %216 : vector<16x1xf32>
    %218 = vector.broadcast %217 : vector<16x1xf32> to vector<16x32xf32>
    %219 = arith.mulf %214, %218 : vector<16x32xf32>
    %220 = vector.broadcast %200 : vector<1x32xf32> to vector<16x32xf32>
    %221 = arith.mulf %219, %220 : vector<16x32xf32>
    %222 = vector.broadcast %201 : vector<1x32xf32> to vector<16x32xf32>
    %223 = arith.addf %221, %222 : vector<16x32xf32>
    %c4_81 = arith.constant 4 : index
    %c0_82 = arith.constant 0 : index
    %c0_83 = arith.constant 0 : index
    %224 = vector.load %arg2[%c4_81, %c0_82, %c0_83] : memref<8x32x32xbf16, #tpu.memory_space<vmem>>, vector<1x32x32xbf16>
    %225 = vector.shape_cast %224 : vector<1x32x32xbf16> to vector<32x32xbf16>
    %c5_84 = arith.constant 5 : index
    %c0_85 = arith.constant 0 : index
    %c0_86 = arith.constant 0 : index
    %226 = vector.load %arg2[%c5_84, %c0_85, %c0_86] : memref<8x32x32xbf16, #tpu.memory_space<vmem>>, vector<1x32x32xbf16>
    %227 = vector.shape_cast %226 : vector<1x32x32xbf16> to vector<32x32xbf16>
    %c6_87 = arith.constant 6 : index
    %c0_88 = arith.constant 0 : index
    %c0_89 = arith.constant 0 : index
    %228 = vector.load %arg2[%c6_87, %c0_88, %c0_89] : memref<8x32x32xbf16, #tpu.memory_space<vmem>>, vector<1x32x32xbf16>
    %229 = vector.shape_cast %228 : vector<1x32x32xbf16> to vector<32x32xbf16>
    %c7_90 = arith.constant 7 : index
    %c0_91 = arith.constant 0 : index
    %c0_92 = arith.constant 0 : index
    %230 = vector.load %arg2[%c7_90, %c0_91, %c0_92] : memref<8x32x32xbf16, #tpu.memory_space<vmem>>, vector<1x32x32xbf16>
    %231 = vector.shape_cast %230 : vector<1x32x32xbf16> to vector<32x32xbf16>
    %c1_93 = arith.constant 1 : index
    %c0_94 = arith.constant 0 : index
    %c0_95 = arith.constant 0 : index
    %232 = vector.load %arg3[%c1_93, %c0_94, %c0_95] : memref<2x32x64xbf16, #tpu.memory_space<vmem>>, vector<1x32x64xbf16>
    %233 = vector.shape_cast %232 : vector<1x32x64xbf16> to vector<32x64xbf16>
    %c1_96 = arith.constant 1 : index
    %c0_97 = arith.constant 0 : index
    %c0_98 = arith.constant 0 : index
    %234 = vector.load %arg4[%c1_96, %c0_97, %c0_98] : memref<2x64x32xbf16, #tpu.memory_space<vmem>>, vector<1x64x32xbf16>
    %235 = vector.shape_cast %234 : vector<1x64x32xbf16> to vector<64x32xbf16>
    %c12 = arith.constant 12 : index
    %c0_99 = arith.constant 0 : index
    %236 = vector.load %arg5[%c12, %c0_99] : memref<22x64xf32, #tpu.memory_space<vmem>>, vector<1x32xf32>
    %237 = arith.truncf %223 : vector<16x32xf32> to vector<16x32xbf16>
    %cst_100 = arith.constant dense<0.000000e+00> : vector<16x32xf32>
    %238 = tpu.matmul %237, %225, %cst_100 {dimension_numbers = #tpu.dot_dimension_numbers<[1], [0], [0], [1], [0, 0, 1, 1], [], []>} : vector<16x32xbf16>, vector<32x32xbf16>, vector<16x32xf32> -> vector<16x32xf32>
    %239 = vector.broadcast %236 : vector<1x32xf32> to vector<16x32xf32>
    %240 = arith.addf %238, %239 : vector<16x32xf32>
    %c13 = arith.constant 13 : index
    %c0_101 = arith.constant 0 : index
    %241 = vector.load %arg5[%c13, %c0_101] : memref<22x64xf32, #tpu.memory_space<vmem>>, vector<1x32xf32>
    %242 = arith.truncf %223 : vector<16x32xf32> to vector<16x32xbf16>
    %cst_102 = arith.constant dense<0.000000e+00> : vector<16x32xf32>
    %243 = tpu.matmul %242, %227, %cst_102 {dimension_numbers = #tpu.dot_dimension_numbers<[1], [0], [0], [1], [0, 0, 1, 1], [], []>} : vector<16x32xbf16>, vector<32x32xbf16>, vector<16x32xf32> -> vector<16x32xf32>
    %244 = vector.broadcast %241 : vector<1x32xf32> to vector<16x32xf32>
    %245 = arith.addf %243, %244 : vector<16x32xf32>
    %c14 = arith.constant 14 : index
    %c0_103 = arith.constant 0 : index
    %246 = vector.load %arg5[%c14, %c0_103] : memref<22x64xf32, #tpu.memory_space<vmem>>, vector<1x32xf32>
    %247 = arith.truncf %223 : vector<16x32xf32> to vector<16x32xbf16>
    %cst_104 = arith.constant dense<0.000000e+00> : vector<16x32xf32>
    %248 = tpu.matmul %247, %229, %cst_104 {dimension_numbers = #tpu.dot_dimension_numbers<[1], [0], [0], [1], [0, 0, 1, 1], [], []>} : vector<16x32xbf16>, vector<32x32xbf16>, vector<16x32xf32> -> vector<16x32xf32>
    %249 = vector.broadcast %246 : vector<1x32xf32> to vector<16x32xf32>
    %250 = arith.addf %248, %249 : vector<16x32xf32>
    %251 = arith.truncf %240 : vector<16x32xf32> to vector<16x32xbf16>
    %252 = arith.truncf %245 : vector<16x32xf32> to vector<16x32xbf16>
    %253 = arith.truncf %250 : vector<16x32xf32> to vector<16x32xbf16>
    %cst_105 = arith.constant 0.000000e+00 : f32
    %254 = vector.broadcast %cst_105 : f32 to vector<8x32xf32>
    %255 = vector.extract_strided_slice %251 {offsets = [0, 0], sizes = [8, 16], strides = [1, 1]} : vector<16x32xbf16> to vector<8x16xbf16>
    %256 = vector.extract_strided_slice %252 {offsets = [0, 0], sizes = [8, 16], strides = [1, 1]} : vector<16x32xbf16> to vector<8x16xbf16>
    %257 = vector.extract_strided_slice %253 {offsets = [0, 0], sizes = [8, 16], strides = [1, 1]} : vector<16x32xbf16> to vector<8x16xbf16>
    %cst_106 = arith.constant dense<0.000000e+00> : vector<8x8xf32>
    %258 = tpu.matmul %255, %256, %cst_106 {dimension_numbers = #tpu.dot_dimension_numbers<[1], [1], [0], [0], [0, 0, 1, 0], [], []>} : vector<8x16xbf16>, vector<8x16xbf16>, vector<8x8xf32> -> vector<8x8xf32>
    %259 = vector.broadcast %1 : vector<1x8xf32> to vector<8x8xf32>
    %260 = arith.addf %258, %259 : vector<8x8xf32>
    %cst_107 = arith.constant dense<0xFF800000> : vector<8xf32>
    %261 = vector.multi_reduction <maximumf>, %260, %cst_107 [1] : vector<8x8xf32> to vector<8xf32>
    %262 = vector.shape_cast %261 : vector<8xf32> to vector<8x1xf32>
    %263 = vector.broadcast %262 : vector<8x1xf32> to vector<8x8xf32>
    %264 = arith.subf %260, %263 : vector<8x8xf32>
    %265 = math.exp %264 : vector<8x8xf32>
    %cst_108 = arith.constant dense<0.000000e+00> : vector<8xf32>
    %266 = vector.multi_reduction <add>, %265, %cst_108 [1] : vector<8x8xf32> to vector<8xf32>
    %267 = vector.shape_cast %266 : vector<8xf32> to vector<8x1xf32>
    %268 = tpu.reciprocal %267 {approx = true} : vector<8x1xf32> -> vector<8x1xf32>
    %269 = vector.broadcast %268 : vector<8x1xf32> to vector<8x8xf32>
    %270 = arith.mulf %265, %269 : vector<8x8xf32>
    %271 = arith.truncf %270 : vector<8x8xf32> to vector<8x8xbf16>
    %cst_109 = arith.constant dense<0.000000e+00> : vector<8x16xf32>
    %272 = tpu.matmul %271, %257, %cst_109 {dimension_numbers = #tpu.dot_dimension_numbers<[1], [0], [0], [1], [0, 0, 1, 1], [], []>} : vector<8x8xbf16>, vector<8x16xbf16>, vector<8x16xf32> -> vector<8x16xf32>
    %273 = arith.truncf %272 : vector<8x16xf32> to vector<8x16xbf16>
    %274 = vector.extract_strided_slice %231 {offsets = [0, 0], sizes = [16, 32], strides = [1, 1]} : vector<32x32xbf16> to vector<16x32xbf16>
    %cst_110 = arith.constant dense<0.000000e+00> : vector<8x32xf32>
    %275 = tpu.matmul %273, %274, %cst_110 {dimension_numbers = #tpu.dot_dimension_numbers<[1], [0], [0], [1], [0, 0, 1, 1], [], []>} : vector<8x16xbf16>, vector<16x32xbf16>, vector<8x32xf32> -> vector<8x32xf32>
    %276 = arith.addf %254, %275 : vector<8x32xf32>
    %277 = vector.extract_strided_slice %251 {offsets = [0, 16], sizes = [8, 16], strides = [1, 1]} : vector<16x32xbf16> to vector<8x16xbf16>
    %278 = vector.extract_strided_slice %252 {offsets = [0, 16], sizes = [8, 16], strides = [1, 1]} : vector<16x32xbf16> to vector<8x16xbf16>
    %279 = vector.extract_strided_slice %253 {offsets = [0, 16], sizes = [8, 16], strides = [1, 1]} : vector<16x32xbf16> to vector<8x16xbf16>
    %cst_111 = arith.constant dense<0.000000e+00> : vector<8x8xf32>
    %280 = tpu.matmul %277, %278, %cst_111 {dimension_numbers = #tpu.dot_dimension_numbers<[1], [1], [0], [0], [0, 0, 1, 0], [], []>} : vector<8x16xbf16>, vector<8x16xbf16>, vector<8x8xf32> -> vector<8x8xf32>
    %281 = vector.broadcast %1 : vector<1x8xf32> to vector<8x8xf32>
    %282 = arith.addf %280, %281 : vector<8x8xf32>
    %cst_112 = arith.constant dense<0xFF800000> : vector<8xf32>
    %283 = vector.multi_reduction <maximumf>, %282, %cst_112 [1] : vector<8x8xf32> to vector<8xf32>
    %284 = vector.shape_cast %283 : vector<8xf32> to vector<8x1xf32>
    %285 = vector.broadcast %284 : vector<8x1xf32> to vector<8x8xf32>
    %286 = arith.subf %282, %285 : vector<8x8xf32>
    %287 = math.exp %286 : vector<8x8xf32>
    %cst_113 = arith.constant dense<0.000000e+00> : vector<8xf32>
    %288 = vector.multi_reduction <add>, %287, %cst_113 [1] : vector<8x8xf32> to vector<8xf32>
    %289 = vector.shape_cast %288 : vector<8xf32> to vector<8x1xf32>
    %290 = tpu.reciprocal %289 {approx = true} : vector<8x1xf32> -> vector<8x1xf32>
    %291 = vector.broadcast %290 : vector<8x1xf32> to vector<8x8xf32>
    %292 = arith.mulf %287, %291 : vector<8x8xf32>
    %293 = arith.truncf %292 : vector<8x8xf32> to vector<8x8xbf16>
    %cst_114 = arith.constant dense<0.000000e+00> : vector<8x16xf32>
    %294 = tpu.matmul %293, %279, %cst_114 {dimension_numbers = #tpu.dot_dimension_numbers<[1], [0], [0], [1], [0, 0, 1, 1], [], []>} : vector<8x8xbf16>, vector<8x16xbf16>, vector<8x16xf32> -> vector<8x16xf32>
    %295 = arith.truncf %294 : vector<8x16xf32> to vector<8x16xbf16>
    %296 = vector.extract_strided_slice %231 {offsets = [16, 0], sizes = [16, 32], strides = [1, 1]} : vector<32x32xbf16> to vector<16x32xbf16>
    %cst_115 = arith.constant dense<0.000000e+00> : vector<8x32xf32>
    %297 = tpu.matmul %295, %296, %cst_115 {dimension_numbers = #tpu.dot_dimension_numbers<[1], [0], [0], [1], [0, 0, 1, 1], [], []>} : vector<8x16xbf16>, vector<16x32xbf16>, vector<8x32xf32> -> vector<8x32xf32>
    %298 = arith.addf %276, %297 : vector<8x32xf32>
    %cst_116 = arith.constant 0.000000e+00 : f32
    %299 = vector.broadcast %cst_116 : f32 to vector<8x32xf32>
    %300 = vector.extract_strided_slice %251 {offsets = [8, 0], sizes = [8, 16], strides = [1, 1]} : vector<16x32xbf16> to vector<8x16xbf16>
    %301 = vector.extract_strided_slice %252 {offsets = [8, 0], sizes = [8, 16], strides = [1, 1]} : vector<16x32xbf16> to vector<8x16xbf16>
    %302 = vector.extract_strided_slice %253 {offsets = [8, 0], sizes = [8, 16], strides = [1, 1]} : vector<16x32xbf16> to vector<8x16xbf16>
    %cst_117 = arith.constant dense<0.000000e+00> : vector<8x8xf32>
    %303 = tpu.matmul %300, %301, %cst_117 {dimension_numbers = #tpu.dot_dimension_numbers<[1], [1], [0], [0], [0, 0, 1, 0], [], []>} : vector<8x16xbf16>, vector<8x16xbf16>, vector<8x8xf32> -> vector<8x8xf32>
    %304 = vector.broadcast %2 : vector<1x8xf32> to vector<8x8xf32>
    %305 = arith.addf %303, %304 : vector<8x8xf32>
    %cst_118 = arith.constant dense<0xFF800000> : vector<8xf32>
    %306 = vector.multi_reduction <maximumf>, %305, %cst_118 [1] : vector<8x8xf32> to vector<8xf32>
    %307 = vector.shape_cast %306 : vector<8xf32> to vector<8x1xf32>
    %308 = vector.broadcast %307 : vector<8x1xf32> to vector<8x8xf32>
    %309 = arith.subf %305, %308 : vector<8x8xf32>
    %310 = math.exp %309 : vector<8x8xf32>
    %cst_119 = arith.constant dense<0.000000e+00> : vector<8xf32>
    %311 = vector.multi_reduction <add>, %310, %cst_119 [1] : vector<8x8xf32> to vector<8xf32>
    %312 = vector.shape_cast %311 : vector<8xf32> to vector<8x1xf32>
    %313 = tpu.reciprocal %312 {approx = true} : vector<8x1xf32> -> vector<8x1xf32>
    %314 = vector.broadcast %313 : vector<8x1xf32> to vector<8x8xf32>
    %315 = arith.mulf %310, %314 : vector<8x8xf32>
    %316 = arith.truncf %315 : vector<8x8xf32> to vector<8x8xbf16>
    %cst_120 = arith.constant dense<0.000000e+00> : vector<8x16xf32>
    %317 = tpu.matmul %316, %302, %cst_120 {dimension_numbers = #tpu.dot_dimension_numbers<[1], [0], [0], [1], [0, 0, 1, 1], [], []>} : vector<8x8xbf16>, vector<8x16xbf16>, vector<8x16xf32> -> vector<8x16xf32>
    %318 = arith.truncf %317 : vector<8x16xf32> to vector<8x16xbf16>
    %319 = vector.extract_strided_slice %231 {offsets = [0, 0], sizes = [16, 32], strides = [1, 1]} : vector<32x32xbf16> to vector<16x32xbf16>
    %cst_121 = arith.constant dense<0.000000e+00> : vector<8x32xf32>
    %320 = tpu.matmul %318, %319, %cst_121 {dimension_numbers = #tpu.dot_dimension_numbers<[1], [0], [0], [1], [0, 0, 1, 1], [], []>} : vector<8x16xbf16>, vector<16x32xbf16>, vector<8x32xf32> -> vector<8x32xf32>
    %321 = arith.addf %299, %320 : vector<8x32xf32>
    %322 = vector.extract_strided_slice %251 {offsets = [8, 16], sizes = [8, 16], strides = [1, 1]} : vector<16x32xbf16> to vector<8x16xbf16>
    %323 = vector.extract_strided_slice %252 {offsets = [8, 16], sizes = [8, 16], strides = [1, 1]} : vector<16x32xbf16> to vector<8x16xbf16>
    %324 = vector.extract_strided_slice %253 {offsets = [8, 16], sizes = [8, 16], strides = [1, 1]} : vector<16x32xbf16> to vector<8x16xbf16>
    %cst_122 = arith.constant dense<0.000000e+00> : vector<8x8xf32>
    %325 = tpu.matmul %322, %323, %cst_122 {dimension_numbers = #tpu.dot_dimension_numbers<[1], [1], [0], [0], [0, 0, 1, 0], [], []>} : vector<8x16xbf16>, vector<8x16xbf16>, vector<8x8xf32> -> vector<8x8xf32>
    %326 = vector.broadcast %2 : vector<1x8xf32> to vector<8x8xf32>
    %327 = arith.addf %325, %326 : vector<8x8xf32>
    %cst_123 = arith.constant dense<0xFF800000> : vector<8xf32>
    %328 = vector.multi_reduction <maximumf>, %327, %cst_123 [1] : vector<8x8xf32> to vector<8xf32>
    %329 = vector.shape_cast %328 : vector<8xf32> to vector<8x1xf32>
    %330 = vector.broadcast %329 : vector<8x1xf32> to vector<8x8xf32>
    %331 = arith.subf %327, %330 : vector<8x8xf32>
    %332 = math.exp %331 : vector<8x8xf32>
    %cst_124 = arith.constant dense<0.000000e+00> : vector<8xf32>
    %333 = vector.multi_reduction <add>, %332, %cst_124 [1] : vector<8x8xf32> to vector<8xf32>
    %334 = vector.shape_cast %333 : vector<8xf32> to vector<8x1xf32>
    %335 = tpu.reciprocal %334 {approx = true} : vector<8x1xf32> -> vector<8x1xf32>
    %336 = vector.broadcast %335 : vector<8x1xf32> to vector<8x8xf32>
    %337 = arith.mulf %332, %336 : vector<8x8xf32>
    %338 = arith.truncf %337 : vector<8x8xf32> to vector<8x8xbf16>
    %cst_125 = arith.constant dense<0.000000e+00> : vector<8x16xf32>
    %339 = tpu.matmul %338, %324, %cst_125 {dimension_numbers = #tpu.dot_dimension_numbers<[1], [0], [0], [1], [0, 0, 1, 1], [], []>} : vector<8x8xbf16>, vector<8x16xbf16>, vector<8x16xf32> -> vector<8x16xf32>
    %340 = arith.truncf %339 : vector<8x16xf32> to vector<8x16xbf16>
    %341 = vector.extract_strided_slice %231 {offsets = [16, 0], sizes = [16, 32], strides = [1, 1]} : vector<32x32xbf16> to vector<16x32xbf16>
    %cst_126 = arith.constant dense<0.000000e+00> : vector<8x32xf32>
    %342 = tpu.matmul %340, %341, %cst_126 {dimension_numbers = #tpu.dot_dimension_numbers<[1], [0], [0], [1], [0, 0, 1, 1], [], []>} : vector<8x16xbf16>, vector<16x32xbf16>, vector<8x32xf32> -> vector<8x32xf32>
    %343 = arith.addf %321, %342 : vector<8x32xf32>
    %344 = tpu.concatenate %298, %343 in 0 : vector<8x32xf32>, vector<8x32xf32> -> vector<16x32xf32>
    %c15 = arith.constant 15 : index
    %c0_127 = arith.constant 0 : index
    %345 = vector.load %arg5[%c15, %c0_127] : memref<22x64xf32, #tpu.memory_space<vmem>>, vector<1x32xf32>
    %346 = vector.broadcast %345 : vector<1x32xf32> to vector<16x32xf32>
    %347 = arith.addf %344, %346 : vector<16x32xf32>
    %348 = arith.addf %223, %347 : vector<16x32xf32>
    %c18 = arith.constant 18 : index
    %c0_128 = arith.constant 0 : index
    %349 = vector.load %arg5[%c18, %c0_128] : memref<22x64xf32, #tpu.memory_space<vmem>>, vector<1x32xf32>
    %c19 = arith.constant 19 : index
    %c0_129 = arith.constant 0 : index
    %350 = vector.load %arg5[%c19, %c0_129] : memref<22x64xf32, #tpu.memory_space<vmem>>, vector<1x32xf32>
    %cst_130 = arith.constant dense<0.000000e+00> : vector<16xf32>
    %351 = vector.multi_reduction <add>, %348, %cst_130 [1] : vector<16x32xf32> to vector<16xf32>
    %352 = vector.shape_cast %351 : vector<16xf32> to vector<16x1xf32>
    %cst_131 = arith.constant 3.200000e+01 : f32
    %353 = vector.broadcast %cst_131 : f32 to vector<16x1xf32>
    %354 = arith.divf %352, %353 : vector<16x1xf32>
    %355 = vector.broadcast %354 : vector<16x1xf32> to vector<16x32xf32>
    %356 = arith.subf %348, %355 : vector<16x32xf32>
    %357 = arith.mulf %356, %356 : vector<16x32xf32>
    %cst_132 = arith.constant dense<0.000000e+00> : vector<16xf32>
    %358 = vector.multi_reduction <add>, %357, %cst_132 [1] : vector<16x32xf32> to vector<16xf32>
    %359 = vector.shape_cast %358 : vector<16xf32> to vector<16x1xf32>
    %cst_133 = arith.constant 3.200000e+01 : f32
    %360 = vector.broadcast %cst_133 : f32 to vector<16x1xf32>
    %361 = arith.divf %359, %360 : vector<16x1xf32>
    %362 = vector.broadcast %354 : vector<16x1xf32> to vector<16x32xf32>
    %363 = arith.subf %348, %362 : vector<16x32xf32>
    %cst_134 = arith.constant 9.99999996E-13 : f32
    %364 = vector.broadcast %cst_134 : f32 to vector<16x1xf32>
    %365 = arith.addf %361, %364 : vector<16x1xf32>
    %366 = math.rsqrt %365 : vector<16x1xf32>
    %367 = vector.broadcast %366 : vector<16x1xf32> to vector<16x32xf32>
    %368 = arith.mulf %363, %367 : vector<16x32xf32>
    %369 = vector.broadcast %349 : vector<1x32xf32> to vector<16x32xf32>
    %370 = arith.mulf %368, %369 : vector<16x32xf32>
    %371 = vector.broadcast %350 : vector<1x32xf32> to vector<16x32xf32>
    %372 = arith.addf %370, %371 : vector<16x32xf32>
    %c16 = arith.constant 16 : index
    %c0_135 = arith.constant 0 : index
    %373 = vector.load %arg5[%c16, %c0_135] : memref<22x64xf32, #tpu.memory_space<vmem>>, vector<1x64xf32>
    %374 = arith.truncf %372 : vector<16x32xf32> to vector<16x32xbf16>
    %cst_136 = arith.constant dense<0.000000e+00> : vector<16x64xf32>
    %375 = tpu.matmul %374, %233, %cst_136 {dimension_numbers = #tpu.dot_dimension_numbers<[1], [0], [0], [1], [0, 0, 1, 1], [], []>} : vector<16x32xbf16>, vector<32x64xbf16>, vector<16x64xf32> -> vector<16x64xf32>
    %376 = vector.broadcast %373 : vector<1x64xf32> to vector<16x64xf32>
    %377 = arith.addf %375, %376 : vector<16x64xf32>
    %cst_137 = arith.constant 5.000000e-01 : f32
    %378 = vector.broadcast %cst_137 : f32 to vector<16x64xf32>
    %379 = arith.mulf %378, %377 : vector<16x64xf32>
    %cst_138 = arith.constant 4.471500e-02 : f32
    %380 = vector.broadcast %cst_138 : f32 to vector<16x64xf32>
    %381 = arith.mulf %380, %377 : vector<16x64xf32>
    %382 = arith.mulf %381, %377 : vector<16x64xf32>
    %383 = arith.mulf %382, %377 : vector<16x64xf32>
    %384 = arith.addf %377, %383 : vector<16x64xf32>
    %cst_139 = arith.constant 0.797884583 : f32
    %385 = vector.broadcast %cst_139 : f32 to vector<16x64xf32>
    %386 = arith.mulf %385, %384 : vector<16x64xf32>
    %387 = math.tanh %386 : vector<16x64xf32>
    %cst_140 = arith.constant 1.000000e+00 : f32
    %388 = vector.broadcast %cst_140 : f32 to vector<16x64xf32>
    %389 = arith.addf %388, %387 : vector<16x64xf32>
    %390 = arith.mulf %379, %389 : vector<16x64xf32>
    %c17 = arith.constant 17 : index
    %c0_141 = arith.constant 0 : index
    %391 = vector.load %arg5[%c17, %c0_141] : memref<22x64xf32, #tpu.memory_space<vmem>>, vector<1x32xf32>
    %392 = arith.truncf %390 : vector<16x64xf32> to vector<16x64xbf16>
    %cst_142 = arith.constant dense<0.000000e+00> : vector<16x32xf32>
    %393 = tpu.matmul %392, %235, %cst_142 {dimension_numbers = #tpu.dot_dimension_numbers<[1], [0], [0], [1], [0, 0, 1, 1], [], []>} : vector<16x64xbf16>, vector<64x32xbf16>, vector<16x32xf32> -> vector<16x32xf32>
    %394 = vector.broadcast %391 : vector<1x32xf32> to vector<16x32xf32>
    %395 = arith.addf %393, %394 : vector<16x32xf32>
    %396 = arith.addf %372, %395 : vector<16x32xf32>
    %c20 = arith.constant 20 : index
    %c0_143 = arith.constant 0 : index
    %397 = vector.load %arg5[%c20, %c0_143] : memref<22x64xf32, #tpu.memory_space<vmem>>, vector<1x32xf32>
    %c21 = arith.constant 21 : index
    %c0_144 = arith.constant 0 : index
    %398 = vector.load %arg5[%c21, %c0_144] : memref<22x64xf32, #tpu.memory_space<vmem>>, vector<1x32xf32>
    %cst_145 = arith.constant dense<0.000000e+00> : vector<16xf32>
    %399 = vector.multi_reduction <add>, %396, %cst_145 [1] : vector<16x32xf32> to vector<16xf32>
    %400 = vector.shape_cast %399 : vector<16xf32> to vector<16x1xf32>
    %cst_146 = arith.constant 3.200000e+01 : f32
    %401 = vector.broadcast %cst_146 : f32 to vector<16x1xf32>
    %402 = arith.divf %400, %401 : vector<16x1xf32>
    %403 = vector.broadcast %402 : vector<16x1xf32> to vector<16x32xf32>
    %404 = arith.subf %396, %403 : vector<16x32xf32>
    %405 = arith.mulf %404, %404 : vector<16x32xf32>
    %cst_147 = arith.constant dense<0.000000e+00> : vector<16xf32>
    %406 = vector.multi_reduction <add>, %405, %cst_147 [1] : vector<16x32xf32> to vector<16xf32>
    %407 = vector.shape_cast %406 : vector<16xf32> to vector<16x1xf32>
    %cst_148 = arith.constant 3.200000e+01 : f32
    %408 = vector.broadcast %cst_148 : f32 to vector<16x1xf32>
    %409 = arith.divf %407, %408 : vector<16x1xf32>
    %410 = vector.broadcast %402 : vector<16x1xf32> to vector<16x32xf32>
    %411 = arith.subf %396, %410 : vector<16x32xf32>
    %cst_149 = arith.constant 9.99999996E-13 : f32
    %412 = vector.broadcast %cst_149 : f32 to vector<16x1xf32>
    %413 = arith.addf %409, %412 : vector<16x1xf32>
    %414 = math.rsqrt %413 : vector<16x1xf32>
    %415 = vector.broadcast %414 : vector<16x1xf32> to vector<16x32xf32>
    %416 = arith.mulf %411, %415 : vector<16x32xf32>
    %417 = vector.broadcast %397 : vector<1x32xf32> to vector<16x32xf32>
    %418 = arith.mulf %416, %417 : vector<16x32xf32>
    %419 = vector.broadcast %398 : vector<1x32xf32> to vector<16x32xf32>
    %420 = arith.addf %418, %419 : vector<16x32xf32>
    %421 = vector.extract_strided_slice %420 {offsets = [0, 0], sizes = [1, 32], strides = [1, 1]} : vector<16x32xf32> to vector<1x32xf32>
    %422 = vector.extract_strided_slice %420 {offsets = [8, 0], sizes = [1, 32], strides = [1, 1]} : vector<16x32xf32> to vector<1x32xf32>
    %423 = tpu.concatenate %421, %422 in 0 : vector<1x32xf32>, vector<1x32xf32> -> vector<2x32xf32>
    %c0_150 = arith.constant 0 : index
    %c0_151 = arith.constant 0 : index
    %424 = vector.load %arg6[%c0_150, %c0_151] : memref<2x32xf32, #tpu.memory_space<vmem>>, vector<2x32xf32>
    tpu.vector_store %arg6[%c0_150, %c0_151], %423 {strides = array<i32>} : memref<2x32xf32, #tpu.memory_space<vmem>>, vector<2x32xf32>,
    return
  }
}

</mosaic_0001>

<bundles_post_ra>
// kernel: text_encoder_forward.1
= control target key start
LH: loop header
LB: loop body
LE: loop exit
PB: predicated region body
PF: predicated region fallthrough
CT: control target
= control target key end

     0   :  { %vm31_vm0 = vcmask 261120   ;;  %s2087_s0 = inlined_call_operand.vmem [shape: f32[16,32], index: 0, kind: input, shape index: {}]   ;;  %s2088_s1 = inlined_call_operand.vmem [shape: f32[2,8], index: 1, kind: input, shape index: {}]   ;;  %s2089_s2 = inlined_call_operand.vmem [shape: bf16[8,32,32], index: 2, kind: input, shape index: {}]   ;;  %s2090_s3 = inlined_call_operand.vmem [shape: bf16[2,32,64], index: 3, kind: input, shape index: {}]   ;;  %s2091_s4 = inlined_call_operand.vmem [shape: bf16[2,64,32], index: 4, kind: input, shape index: {}]   ;;  %s2092_s5 = inlined_call_operand.vmem [shape: f32[22,64], index: 5, kind: input, shape index: {}]   ;;  %s2093_s6 = inlined_call_operand.hbm [shape: f32[2,32], index: 6, kind: output, shape index: {}]  }
   0x1   :  { %v25_v0 = vld [vmem:[%s2087_s0] sm:$0xff]  ;;  %v26_v1 = vld [vmem:[%s2087_s0 + $0x8] sm:$0xff] }
   0x2   :  { %v32_v2 = vsel %vm31_vm0, %v25_v0, 0.0  ;;  %v35_v3 = vsel %vm31_vm0, %v26_v1, 0.0 }
   0x3   :  { %33 = vadd.xlane.f32.xlu0 %v32_v2 }
   0x4   :  { %11 = vsyncpa [#allocation3], 0  ;;  %v1732_v4 = vmov 32.0   ;;  %v1590_v21 = vld [vmem:[%s2089_s2 + $0x8] sm:$0xff]  ;;  %v1592_v22 = vld [vmem:[%s2089_s2 + $0x18] sm:$0xff]  ;;  %vm215_vm8 = vcmask 130048  }
   0x5   :  { %1644 = vrcp.f32 %v1732_v4  ;;  %v1594_v23 = vld [vmem:[%s2089_s2 + $0x28] sm:$0xff]  ;;  %144 = vmatpush.bf16.msra.mxu0 %v1590_v21  ;;  %172 = vmatpush.bf16.msra.mxu1 %v1592_v22  ;;  %v1589_v25 = vld [vmem:[%s2089_s2] sm:$0xff]  ;;  %v1591_v26 = vld [vmem:[%s2089_s2 + $0x10] sm:$0xff]  ;;  %s1733_s22 = smov 112   ;;  %vm251_vm9 = vcmask 1043456   ;;  %vm235_vm10 = vcmask 64512  }
   0x6   :  { %200 = vmatpush.bf16.msra.mxu2 %v1594_v23  ;;  %v1593_v28 = vld [vmem:[%s2089_s2 + $0x20] sm:$0xff]  ;;  %s1734_s25 = smov [#allocation2]  }
   0x7   :  { %v1620_v46 = vld [vmem:[%s2092_s5] ss:$0 sm:$0xff]  ;;  %v1621_v51 = vld [vmem:[%s2092_s5 + $0x1] ss:$0 sm:$0xff]  ;;  %v1623_v56 = vld [vmem:[%s2092_s5 + $0x3] ss:$0 sm:$0xff] }
   0x8   :  { %v1622_v57 = vld [vmem:[%s2092_s5 + $0x2] ss:$0 sm:$0xff]  ;;  %v1624_v63 = vld [vmem:[%s2092_s5 + $0x4] ss:$0 sm:$0xff]  ;;  %s1392_s26 = sshll.u32 %s1734_s25, 4  ;;  %s1393_s26 = int_to_ptr.vmem [resolvable:$true] %s1392_s26 }
   0x9   :  { %145 = vmatpush.bf16.msra.mxu0 %v1589_v25  ;;  %173 = vmatpush.bf16.msra.mxu1 %v1591_v26 }
   0xa   :  { %201 = vmatpush.bf16.msra.mxu2 %v1593_v28 }
   0xb   :  { %36 = vadd.xlane.f32.xlu0 %v35_v3  ;;  %v1645_v5 = vpop.eup %1644 }
   0xc   :  { %v39_v6 = vmul.f32 32.0, %v1645_v5  ;;  %vm43_vm1 = vweird.f32 %v1645_v5 }
   0xe   :  { %v40_v7 = vsub.f32 1.0, %v39_v6 }
  0x10   :  { %v41_v8 = vmul.f32 %v1645_v5, %v40_v7 }
  0x12   :  { %v42_v9 = vadd.f32 %v1645_v5, %v41_v8 }
  0x14   :  { %v1778_v10 = vsel %vm43_vm1, %v1645_v5, %v42_v9 }
  0x76   :  { %v34_v11 = vpop.xlane.xlu0 %33 }
  0x77   :  { %v45_v12 = vmul.f32 %v1778_v10, %v34_v11 }
  0x79   :  { %v47_v13 = vsub.f32 %v25_v0, %v45_v12 }
  0x7b   :  { %v49_v14 = vmul.f32 %v47_v13, %v47_v13 }
  0x7d   :  { %v51_v15 = vsel %vm31_vm0, %v49_v14, 0.0 }
  0x7e   :  { %52 = vadd.xlane.f32.xlu1 %v51_v15  ;;  %v37_v16 = vpop.xlane.xlu0 %36 }
  0x7f   :  { %v46_v17 = vmul.f32 %v1778_v10, %v37_v16 }
  0x81   :  { %v48_v18 = vsub.f32 %v26_v1, %v46_v17 }
  0x83   :  { %v50_v19 = vmul.f32 %v48_v18, %v48_v18 }
  0x85   :  { %v54_v20 = vsel %vm31_vm0, %v50_v19, 0.0 }
  0x86   :  { %55 = vadd.xlane.f32.xlu1 %v54_v20 }
  0xf1   :  { %v53_v24 = vpop.xlane.xlu1 %52 }
  0xf2   :  { %v57_v27 = vmul.f32 %v53_v24, %v1778_v10 }
  0xf4   :  { %v59_v29 = vadd.f32 1e-12, %v57_v27 }
  0xf6   :  { %1646 = vrsqrt.f32 %v59_v29  ;;  %vm67_vm3 = vweird.f32 %v59_v29 }
  0xf9   :  { %v56_v30 = vpop.xlane.xlu1 %55 }
  0xfa   :  { %v58_v31 = vmul.f32 %v56_v30, %v1778_v10 }
  0xfc   :  { %v1647_v32 = vpop.eup %1646  ;;  %v60_v33 = vadd.f32 1e-12, %v58_v31 }
  0xfd   :  { %v62_v34 = vmul.f32 %v1647_v32, %v59_v29  ;;  %vm68_vm2 = vweird.f32 %v1647_v32  ;;  %v1843_v29 = vld [vmem:[%s2088_s1] ss:$0 sm:$0xff] }
  0xfe   :  { %1648 = vrsqrt.f32 %v60_v33  ;;  %vm69_vm4 = vmor %vm67_vm3, %vm68_vm2  ;;  %vm77_vm6 = vweird.f32 %v60_v33  ;;  %vm664_vm2 = vcmask 523264  }
  0xff   :  { %v63_v35 = vmul.f32 %v1647_v32, %v62_v34 }
 0x101   :  { %v64_v36 = vmul.f32 0.5, %v63_v35 }
 0x103   :  { %v65_v37 = vsub.f32 1.5, %v64_v36 }
 0x104   :  { %v1649_v38 = vpop.eup %1648 }
 0x105   :  { %v66_v39 = vmul.f32 %v1647_v32, %v65_v37  ;;  %v72_v40 = vmul.f32 %v1649_v38, %v60_v33  ;;  %vm78_vm5 = vweird.f32 %v1649_v38 }
 0x106   :  { %vm79_vm7 = vmor %vm77_vm6, %vm78_vm5 }
 0x107   :  { %v73_v41 = vmul.f32 %v1649_v38, %v72_v40  ;;  %v70_v42 = vsel %vm69_vm4, %v1647_v32, %v66_v39 }
 0x108   :  { %v81_v45 = vmul.f32 %v70_v42, %v47_v13 }
 0x109   :  { %v74_v43 = vmul.f32 0.5, %v73_v41 }
 0x10a   :  { %v84_v50 = vmul.f32 %v1620_v46, %v81_v45 }
 0x10b   :  { %v75_v44 = vsub.f32 1.5, %v74_v43 }
 0x10c   :  { %v1810_v53 = vadd.f32 %v1621_v51, %v84_v50 }
 0x10d   :  { %v76_v47 = vmul.f32 %v1649_v38, %v75_v44 }
 0x10f   :  { %v80_v48 = vsel %vm79_vm7, %v1649_v38, %v76_v47 }
 0x110   :  { %v82_v49 = vmul.f32 %v80_v48, %v48_v18 }
 0x112   :  { %v85_v52 = vmul.f32 %v1620_v46, %v82_v49  ;;  %v1596_v49 = vld [vmem:[%s2089_s2 + $0x38] sm:$0xff] }
 0x114   :  { %v1812_v54 = vadd.f32 %v1621_v51, %v85_v52 }
 0x116   :  { %v121_v55 = vpack.c.bf16 %v1812_v54, %v1810_v53 }
 0x118   :  { %1423 = vmatmul.msk.bf16.vlgmr.msra.gmra.mxu0 %vm31_vm0, %v121_v55  ;;  %1432 = vmatmul.msk.bf16.vlgmr.msra.gmra.mxu1 %vm31_vm0, %v121_v55 }
 0x119   :  { %1441 = vmatmul.msk.bf16.vlgmr.msra.gmra.mxu2 %vm31_vm0, %v121_v55 }
 0x195   :  { %v147_v58 = vpop.f32.mrf.mxu0  ;;  %v175_v59 = vpop.f32.mrf.mxu1 }
 0x196   :  { %v176_v60 = vadd.f32 %v1623_v56, %v175_v59  ;;  %v148_v61 = vadd.f32 %v1622_v57, %v147_v58 }
 0x198   :  { %v210_v62 = vpack.c.bf16 %v176_v60, %v176_v60  ;;  %v208_v2 = vpack.c.bf16 %v148_v61, %v148_v61  ;;  %v1595_v61 = vld [vmem:[%s2089_s2 + $0x30] sm:$0xff] }
 0x19a   :  { %v220_v0 = vsel %vm215_vm8, %v210_v62, 0  ;;  %v275_v1 = vunpack.c.l.b16 %v210_v62  ;;  %v270_v7 = vunpack.c.l.b16 %v208_v2 }
 0x19b   :  { %229 = vmatpush.bf16.xpose.msra.mxu3 %v220_v0 }
 0x19c   :  { %v203_v3 = vpop.f32.mrf.mxu2  ;;  %v276_v4 = vpack.c.b16 %v275_v1, %v275_v1  ;;  %v271_v9 = vpack.c.b16 %v270_v7, %v270_v7  ;;  %v1864_v1 = vld [vmem:[%s2088_s1 + $0x1] ss:$0 sm:$0xff] }
 0x19d   :  { %v204_v5 = vadd.f32 %v1624_v63, %v203_v3  ;;  %v177_v13 = vpop.f32.mrf.mxu1  ;;  %v149_v23 = vpop.f32.mrf.mxu0 }
 0x19e   :  { %277 = vrot.lane.b32.xlu2 %v276_v4, %s1733_s22  ;;  %v178_v14 = vadd.f32 %v1623_v56, %v177_v13  ;;  %v150_v27 = vadd.f32 %v1622_v57, %v149_v23 }
 0x19f   :  { %v212_v6 = vpack.c.bf16 %v204_v5, %v204_v5 }
 0x1a0   :  { %v211_v15 = vpack.c.bf16 %v178_v14, %v178_v14  ;;  %v209_v28 = vpack.c.bf16 %v150_v27, %v150_v27 }
 0x1a1   :  { %v253_v8 = vsel %vm251_vm9, %v212_v6, 0  ;;  %v311_v11 = vunpack.c.l.b16 %v212_v6 }
 0x1a2   :  { %262 = vmatpush.bf16.msrb.mxu0 %v253_v8  ;;  %1442 = vmatmul.msk.bf16.vlgmr.msra.gmra.mxu3 %vm215_vm8, %v208_v2  ;;  %v384_v18 = vsel %vm215_vm8, %v211_v15, 0  ;;  %v437_v39 = vunpack.c.l.b16 %v211_v15  ;;  %v432_v59 = vunpack.c.l.b16 %v209_v28 }
 0x1a3   :  { %v312_v12 = vpack.c.b16 %v311_v11, %v311_v11  ;;  %351 = vmatpush.bf16.msrb.mxu3 %v1596_v49 }
 0x1a4   :  { %v205_v19 = vpop.f32.mrf.mxu2  ;;  %v438_v40 = vpack.c.b16 %v437_v39, %v437_v39  ;;  %v433_v60 = vpack.c.b16 %v432_v59, %v432_v59 }
 0x1a5   :  { %v206_v21 = vadd.f32 %v1624_v63, %v205_v19 }
 0x1a6   :  { %272 = vrot.lane.b32.xlu2 %v271_v9, %s1733_s22  ;;  %373 = vmatpush.bf16.msra.mxu0 %v1595_v61 }
 0x1a7   :  { %v213_v22 = vpack.c.bf16 %v206_v21, %v206_v21 }
 0x1a9   :  { %v415_v26 = vsel %vm251_vm9, %v213_v22, 0  ;;  %v473_v47 = vunpack.c.l.b16 %v213_v22 }
 0x1ab   :  { %v474_v48 = vpack.c.b16 %v473_v47, %v473_v47 }
 0x1ae   :  { %313 = vrot.lane.b32.xlu2 %v312_v12, %s1733_s22 }
 0x1f8   :  { %v278_v16 = vpop.permute.xlu2 %277 }
 0x1f9   :  { %v283_v17 = vsel %vm215_vm8, %v278_v16, 0 }
 0x1fa   :  { %292 = vmatpush.bf16.xpose.msrb.mxu1 %v283_v17 }
 0x200   :  { %v273_v20 = vpop.permute.xlu2 %272 }
 0x201   :  { %1444 = vmatmul.msk.bf16.vlgmr.msrb.gmra.mxu1 %vm215_vm8, %v273_v20 }
 0x202   :  { %393 = vmatpush.bf16.xpose.msra.mxu1 %v384_v18 }
 0x208   :  { %v314_v24 = vpop.permute.xlu2 %313 }
 0x209   :  { %v319_v25 = vsel %vm251_vm9, %v314_v24, 0 }
 0x20a   :  { %328 = vmatpush.bf16.msrb.mxu2 %v319_v25  ;;  %507 = vmatpush.bf16.msrb.mxu1 %v1596_v49 }
 0x20e   :  { %424 = vmatpush.bf16.msra.mxu2 %v415_v26 }
 0x211   :  { %1456 = vmatmul.msk.bf16.vlgmr.msra.gmra.mxu1 %vm215_vm8, %v209_v28 }
 0x225   :  { %v231_v30 = vpop.f32.mrf.mxu3 }
 0x226   :  { %v232_v31 = vadd.f32 %v1843_v29, %v231_v30 }
 0x228   :  { %v236_v32 = vsel %vm235_vm10, %v232_v31, -inf }
 0x229   :  { %237 = vmax.xlane.f32.xlu2 %v236_v32 }
 0x22d   :  { %v233_v33 = vpop.f32.mrf.mxu3 }
 0x27e   :  { %v294_v34 = vpop.f32.mrf.mxu1 }
 0x27f   :  { %v295_v35 = vadd.f32 %v1843_v29, %v294_v34 }
 0x281   :  { %v298_v36 = vsel %vm235_vm10, %v295_v35, -inf }
 0x282   :  { %299 = vmax.xlane.f32.xlu0 %v298_v36 }
 0x286   :  { %v296_v37 = vpop.f32.mrf.mxu1 }
 0x287   :  { %v1627_v37 = vld [vmem:[%s2092_s5 + $0x5] ss:$0 sm:$0xff] }
 0x28e   :  { %v395_v38 = vpop.f32.mrf.mxu1 }
 0x28f   :  { %v396_v3 = vadd.f32 %v1864_v1, %v395_v38 }
 0x291   :  { %v399_v4 = vsel %vm235_vm10, %v396_v3, -inf }
 0x296   :  { %v397_v41 = vpop.f32.mrf.mxu1  ;;  %439 = vrot.lane.b32.xlu0 %v438_v40, %s1733_s22 }
 0x29c   :  { %v238_v42 = vpop.xlane.xlu2 %237 }
 0x29d   :  { %v239_v43 = vsub.f32 %v232_v31, %v238_v42 }
 0x29f   :  { %v240_v44 = vmul.f32 1.442695, %v239_v43 }
 0x2a1   :  { %1650 = vpow2.f32 %v240_v44 }
 0x2a7   :  { %v1651_v45 = vpop.eup %1650 }
 0x2a8   :  { %v242_v46 = vsel %vm235_vm10, %v1651_v45, 0.0 }
 0x2c0   :  { %243 = vadd.xlane.f32.xlu0 %v242_v46 }
 0x2d4   :  { %475 = vrot.lane.b32.xlu0 %v474_v48, %s1733_s22 }
 0x2f5   :  { %v300_v50 = vpop.xlane.xlu0 %299 }
 0x2f6   :  { %v301_v51 = vsub.f32 %v295_v35, %v300_v50 }
 0x2f8   :  { %v302_v52 = vmul.f32 1.442695, %v301_v51 }
 0x2fa   :  { %1652 = vpow2.f32 %v302_v52 }
 0x300   :  { %v1653_v55 = vpop.eup %1652 }
 0x301   :  { %v304_v56 = vsel %vm235_vm10, %v1653_v55, 0.0 }
 0x302   :  { %305 = vadd.xlane.f32.xlu1 %v304_v56 }
 0x308   :  { %v440_v57 = vpop.permute.xlu0 %439 }
 0x309   :  { %v445_v58 = vsel %vm215_vm8, %v440_v57, 0 }
 0x30a   :  { %454 = vmatpush.bf16.xpose.msra.mxu3 %v445_v58 }
 0x31b   :  { %434 = vrot.lane.b32.xlu1 %v433_v60, %s1733_s22 }
 0x333   :  { %v244_v62 = vpop.xlane.xlu0 %243 }
 0x334   :  { %1654 = vrcp.f32 %v244_v62 }
 0x33a   :  { %v1655_v63 = vpop.eup %1654 }
 0x33b   :  { %v246_v0 = vmul.f32 %v1655_v63, %v1651_v45 }
 0x33d   :  { %v247_v2 = vpack.c.bf16 %v246_v0, %v246_v0 }
 0x33f   :  { %1443 = vmatmul.msk.bf16.vlgmr.msrb.gmra.mxu0 %vm235_vm10, %v247_v2 }
 0x345   :  { %400 = vmax.xlane.f32.xlu1 %v399_v4 }
 0x346   :  { %v476_v5 = vpop.permute.xlu0 %475 }
 0x347   :  { %v481_v6 = vsel %vm251_vm9, %v476_v5, 0 }
 0x348   :  { %490 = vmatpush.bf16.msrb.mxu0 %v481_v6 }
 0x375   :  { %v306_v7 = vpop.xlane.xlu1 %305 }
 0x376   :  { %1656 = vrcp.f32 %v306_v7 }
 0x37c   :  { %v1657_v8 = vpop.eup %1656 }
 0x37d   :  { %v308_v9 = vmul.f32 %v1657_v8, %v1653_v55 }
 0x37f   :  { %v309_v11 = vpack.c.bf16 %v308_v9, %v308_v9 }
 0x381   :  { %1445 = vmatmul.msk.bf16.vlgmr.msrb.gmra.mxu2 %vm235_vm10, %v309_v11 }
 0x382   :  { %523 = vmatpush.bf16.msrb.mxu2 %v1595_v61 }
 0x38d   :  { %v435_v18 = vpop.permute.xlu1 %434 }
 0x3b8   :  { %v401_v22 = vpop.xlane.xlu1 %400 }
 0x3b9   :  { %v402_v24 = vsub.f32 %v396_v3, %v401_v22 }
 0x3bb   :  { %v403_v25 = vmul.f32 1.442695, %v402_v24 }
 0x3bc   :  { %v264_v12 = vpop.f32.mrf.mxu0 }
 0x3bd   :  { %v268_v13 = vpack.c.bf16 %v264_v12, %v264_v12  ;;  %1658 = vpow2.f32 %v403_v25 }
 0x3bf   :  { %1455 = vmatmul.msk.bf16.vlgmr.msra.gmra.mxu0 %vm215_vm8, %v268_v13 }
 0x3c3   :  { %v1659_v30 = vpop.eup %1658 }
 0x3c4   :  { %v266_v14 = vpop.f32.mrf.mxu0  ;;  %v405_v32 = vsel %vm235_vm10, %v1659_v30, 0.0 }
 0x404   :  { %v330_v15 = vpop.f32.mrf.mxu2 }
 0x405   :  { %v334_v16 = vpack.c.bf16 %v330_v15, %v330_v15 }
 0x407   :  { %1450 = vmatmul.msk.bf16.vlgmr.msrb.gmra.mxu3 %vm215_vm8, %v334_v16 }
 0x40c   :  { %v332_v17 = vpop.f32.mrf.mxu2 }
 0x417   :  { %1458 = vmatmul.msk.bf16.vlgmr.msra.gmra.mxu3 %vm215_vm8, %v435_v18  ;;  %v1597_v18 = vld [vmem:[%s2090_s3] sm:$0xff] }
 0x43c   :  { %v375_v19 = vpop.f32.mrf.mxu0 }
 0x444   :  { %v377_v20 = vpop.f32.mrf.mxu0 }
 0x48a   :  { %v353_v21 = vpop.f32.mrf.mxu3 }
 0x48b   :  { %v376_v36 = vadd.f32 %v375_v19, %v353_v21 }
 0x48d   :  { %v531_v40 = vadd.f32 %v1627_v37, %v376_v36 }
 0x48f   :  { %v533_v44 = vadd.f32 %v531_v40, %v1810_v53 }
 0x491   :  { %v537_v46 = vsel %vm31_vm0, %v533_v44, 0.0 }
 0x492   :  { %v355_v23 = vpop.f32.mrf.mxu3 }
 0x49a   :  { %v456_v26 = vpop.f32.mrf.mxu3 }
 0x49b   :  { %v457_v27 = vadd.f32 %v1864_v1, %v456_v26 }
 0x49d   :  { %v460_v28 = vsel %vm235_vm10, %v457_v27, -inf }
 0x49e   :  { %461 = vmax.xlane.f32.xlu2 %v460_v28 }
 0x4a2   :  { %v458_v31 = vpop.f32.mrf.mxu3 }
 0x4a6   :  { %406 = vadd.xlane.f32.xlu2 %v405_v32 }
 0x511   :  { %v462_v33 = vpop.xlane.xlu2 %461 }
 0x512   :  { %v463_v34 = vsub.f32 %v457_v27, %v462_v33 }
 0x514   :  { %v464_v35 = vmul.f32 1.442695, %v463_v34  ;;  %v1628_v34 = vld [vmem:[%s2092_s5 + $0x8] ss:$0 sm:$0xff] }
 0x516   :  { %1660 = vpow2.f32 %v464_v35 }
 0x519   :  { %v407_v38 = vpop.xlane.xlu2 %406 }
 0x51a   :  { %1662 = vrcp.f32 %v407_v38  ;;  %v1629_v38 = vld [vmem:[%s2092_s5 + $0x9] ss:$0 sm:$0xff] }
 0x51c   :  { %v1661_v39 = vpop.eup %1660 }
 0x51d   :  { %v466_v41 = vsel %vm235_vm10, %v1661_v39, 0.0 }
 0x51e   :  { %467 = vadd.xlane.f32.xlu2 %v466_v41 }
 0x520   :  { %v1663_v42 = vpop.eup %1662 }
 0x521   :  { %v409_v43 = vmul.f32 %v1663_v42, %v1659_v30 }
 0x523   :  { %v410_v45 = vpack.c.bf16 %v409_v43, %v409_v43 }
 0x525   :  { %1457 = vmatmul.msk.bf16.vlgmr.msra.gmra.mxu2 %vm235_vm10, %v410_v45  ;;  %v1602_v45 = vld [vmem:[%s2091_s4 + $0x18] sm:$0xff] }
 0x526   :  { %538 = vadd.xlane.f32.xlu2 %v537_v46  ;;  %672 = vmatpush.bf16.msra.mxu0 %v1602_v45  ;;  %v1601_v46 = vld [vmem:[%s2091_s4 + $0x10] sm:$0xff] }
 0x52a   :  { %673 = vmatpush.bf16.msra.mxu0 %v1601_v46 }
 0x591   :  { %v468_v47 = vpop.xlane.xlu2 %467 }
 0x592   :  { %1664 = vrcp.f32 %v468_v47  ;;  %v1600_v47 = vld [vmem:[%s2091_s4 + $0x8] sm:$0xff] }
 0x593   :  { %674 = vmatpush.bf16.msra.mxu0 %v1600_v47 }
 0x598   :  { %v1665_v48 = vpop.eup %1664 }
 0x599   :  { %v470_v49 = vmul.f32 %v1665_v48, %v1661_v39  ;;  %v539_v50 = vpop.xlane.xlu2 %538  ;;  %v1599_v48 = vld [vmem:[%s2091_s4] sm:$0xff] }
 0x59a   :  { %v543_v51 = vmul.f32 %v539_v50, %v1778_v10  ;;  %675 = vmatpush.bf16.msra.mxu0 %v1599_v48 }
 0x59b   :  { %v471_v52 = vpack.c.bf16 %v470_v49, %v470_v49  ;;  %v1630_v49 = vld [vmem:[%s2092_s5 + $0x6] ss:$0 sm:$0xff] }
 0x59c   :  { %v545_v55 = vsub.f32 %v533_v44, %v543_v51 }
 0x59d   :  { %1459 = vmatmul.msk.bf16.vlgmr.msrb.gmra.mxu0 %vm235_vm10, %v471_v52 }
 0x59e   :  { %v547_v56 = vmul.f32 %v545_v55, %v545_v55 }
 0x5a0   :  { %v549_v53 = vsel %vm31_vm0, %v547_v56, 0.0 }
 0x5a1   :  { %550 = vadd.xlane.f32.xlu2 %v549_v53 }
 0x5a8   :  { %v426_v57 = vpop.f32.mrf.mxu2 }
 0x5a9   :  { %v430_v58 = vpack.c.bf16 %v426_v57, %v426_v57 }
 0x5ab   :  { %1461 = vmatmul.msk.bf16.vlgmr.msrb.gmra.mxu2 %vm215_vm8, %v430_v58 }
 0x5b0   :  { %v428_v59 = vpop.f32.mrf.mxu2 }
 0x614   :  { %v551_v14 = vpop.xlane.xlu2 %550 }
 0x615   :  { %v555_v15 = vmul.f32 %v551_v14, %v1778_v10 }
 0x617   :  { %v557_v16 = vadd.f32 1e-12, %v555_v15 }
 0x619   :  { %1666 = vrsqrt.f32 %v557_v16  ;;  %vm565_vm12 = vweird.f32 %v557_v16 }
 0x61a   :  { %v492_v60 = vpop.f32.mrf.mxu0 }
 0x61b   :  { %v496_v61 = vpack.c.bf16 %v492_v60, %v492_v60 }
 0x61d   :  { %1460 = vmatmul.msk.bf16.vlgmr.msrb.gmra.mxu1 %vm215_vm8, %v496_v61 }
 0x61f   :  { %v1667_v17 = vpop.eup %1666 }
 0x620   :  { %v560_v19 = vmul.f32 %v1667_v17, %v557_v16  ;;  %vm566_vm11 = vweird.f32 %v1667_v17 }
 0x621   :  { %vm567_vm13 = vmor %vm565_vm12, %vm566_vm11 }
 0x622   :  { %v494_v62 = vpop.f32.mrf.mxu0  ;;  %v561_v20 = vmul.f32 %v1667_v17, %v560_v19 }
 0x624   :  { %v562_v24 = vmul.f32 0.5, %v561_v20 }
 0x626   :  { %v563_v25 = vsub.f32 1.5, %v562_v24 }
 0x628   :  { %v564_v27 = vmul.f32 %v1667_v17, %v563_v25 }
 0x62a   :  { %v568_v31 = vsel %vm567_vm13, %v1667_v17, %v564_v27 }
 0x62b   :  { %v579_v35 = vmul.f32 %v568_v31, %v545_v55  ;;  %v1604_v31 = vld [vmem:[%s2089_s2 + $0x48] sm:$0xff] }
 0x62c   :  { %794 = vmatpush.bf16.msra.mxu1 %v1604_v31 }
 0x62d   :  { %v582_v39 = vmul.f32 %v1628_v34, %v579_v35 }
 0x62e   :  { %v525_v63 = vpop.f32.mrf.mxu2 }
 0x62f   :  { %v585_v42 = vadd.f32 %v1629_v38, %v582_v39  ;;  %v1607_v39 = vld [vmem:[%s2089_s2 + $0x60] sm:$0xff] }
 0x636   :  { %v527_v0 = vpop.f32.mrf.mxu2 }
 0x69a   :  { %v509_v2 = vpop.f32.mrf.mxu1 }
 0x69b   :  { %v526_v3 = vadd.f32 %v525_v63, %v509_v2 }
 0x69d   :  { %v532_v4 = vadd.f32 %v1627_v37, %v526_v3 }
 0x69f   :  { %v534_v5 = vadd.f32 %v532_v4, %v1812_v54  ;;  %v1598_v54 = vld [vmem:[%s2090_s3 + $0x8] sm:$0xff] }
 0x6a0   :  { %611 = vmatpush.bf16.msrb.mxu3 %v1598_v54 }
 0x6a1   :  { %v540_v6 = vsel %vm31_vm0, %v534_v5, 0.0 }
 0x6a2   :  { %541 = vadd.xlane.f32.xlu1 %v540_v6  ;;  %v511_v7 = vpop.f32.mrf.mxu1 }
 0x6a4   :  { %612 = vmatpush.bf16.msrb.mxu3 %v1597_v18 }
 0x715   :  { %v542_v8 = vpop.xlane.xlu1 %541 }
 0x716   :  { %v544_v9 = vmul.f32 %v542_v8, %v1778_v10 }
 0x718   :  { %v546_v11 = vsub.f32 %v534_v5, %v544_v9 }
 0x71a   :  { %v548_v12 = vmul.f32 %v546_v11, %v546_v11 }
 0x71c   :  { %v552_v13 = vsel %vm31_vm0, %v548_v12, 0.0  ;;  %v1631_v12 = vld [vmem:[%s2092_s5 + $0x7] ss:$0 sm:$0xff] }
 0x71d   :  { %553 = vadd.xlane.f32.xlu1 %v552_v13 }
 0x790   :  { %v554_v21 = vpop.xlane.xlu1 %553 }
 0x791   :  { %v556_v22 = vmul.f32 %v554_v21, %v1778_v10 }
 0x793   :  { %v558_v23 = vadd.f32 1e-12, %v556_v22 }
 0x795   :  { %1668 = vrsqrt.f32 %v558_v23  ;;  %vm575_vm15 = vweird.f32 %v558_v23 }
 0x79b   :  { %v1669_v26 = vpop.eup %1668 }
 0x79c   :  { %v570_v28 = vmul.f32 %v1669_v26, %v558_v23  ;;  %vm576_vm14 = vweird.f32 %v1669_v26 }
 0x79d   :  { %vm577_vm1 = vmor %vm575_vm15, %vm576_vm14 }
 0x79e   :  { %v571_v30 = vmul.f32 %v1669_v26, %v570_v28 }
 0x7a0   :  { %v572_v32 = vmul.f32 0.5, %v571_v30 }
 0x7a2   :  { %v573_v33 = vsub.f32 1.5, %v572_v32  ;;  %v1606_v32 = vld [vmem:[%s2089_s2 + $0x58] sm:$0xff] }
 0x7a3   :  { %822 = vmatpush.bf16.msra.mxu2 %v1606_v32 }
 0x7a4   :  { %v574_v36 = vmul.f32 %v1669_v26, %v573_v33  ;;  %v1608_v33 = vld [vmem:[%s2089_s2 + $0x68] sm:$0xff] }
 0x7a5   :  { %850 = vmatpush.bf16.msra.mxu3 %v1608_v33 }
 0x7a6   :  { %v578_v37 = vsel %vm577_vm1, %v1669_v26, %v574_v36 }
 0x7a7   :  { %v580_v40 = vmul.f32 %v578_v37, %v546_v11  ;;  %v1603_v37 = vld [vmem:[%s2089_s2 + $0x40] sm:$0xff] }
 0x7a8   :  { %795 = vmatpush.bf16.msra.mxu1 %v1603_v37 }
 0x7a9   :  { %v583_v41 = vmul.f32 %v1628_v34, %v580_v40  ;;  %851 = vmatpush.bf16.msra.mxu3 %v1607_v39 }
 0x7ab   :  { %v586_v43 = vadd.f32 %v1629_v38, %v583_v41  ;;  %v1605_v38 = vld [vmem:[%s2089_s2 + $0x50] sm:$0xff] }
 0x7ac   :  { %823 = vmatpush.bf16.msra.mxu2 %v1605_v38 }
 0x7ad   :  { %v588_v44 = vpack.c.bf16 %v586_v43, %v585_v42 }
 0x7af   :  { %1470 = vmatmul.msk.bf16.vlgmr.msrb.gmra.mxu3 %vm31_vm0, %v588_v44 }
 0x832   :  { %v614_v50 = vpop.f32.mrf.mxu3 }
 0x833   :  { %v615_v51 = vadd.f32 %v1630_v49, %v614_v50 }
 0x835   :  { %v621_v52 = vmul.f32 0.044715, %v615_v51  ;;  %v619_v5 = vmul.f32 0.5, %v615_v51 }
 0x837   :  { %v623_v55 = vmul.f32 %v621_v52, %v615_v51 }
 0x839   :  { %v625_v56 = vmul.f32 %v623_v55, %v615_v51 }
 0x83a   :  { %v616_v53 = vpop.f32.mrf.mxu3 }
 0x83b   :  { %v627_v57 = vadd.f32 %v625_v56, %v615_v51  ;;  %v617_v58 = vadd.f32 %v1630_v49, %v616_v53  ;;  %v1632_v53 = vld [vmem:[%s2092_s5 + $0xa] ss:$0 sm:$0xff] }
 0x83d   :  { %v622_v59 = vmul.f32 0.044715, %v617_v58  ;;  %v629_v60 = vmul.f32 0.7978846, %v627_v57  ;;  %v620_v6 = vmul.f32 0.5, %v617_v58 }
 0x83f   :  { %v624_v61 = vmul.f32 %v622_v59, %v617_v58  ;;  %1670 = vtanh.f32 %v629_v60  ;;  %v1633_v60 = vld [vmem:[%s2092_s5 + $0xb] ss:$0 sm:$0xff] }
 0x841   :  { %v626_v62 = vmul.f32 %v624_v61, %v617_v58 }
 0x843   :  { %v628_v63 = vadd.f32 %v626_v62, %v617_v58 }
 0x845   :  { %v630_v0 = vmul.f32 0.7978846, %v628_v63  ;;  %v1671_v2 = vpop.eup %1670 }
 0x846   :  { %v633_v3 = vadd.f32 1.0, %v1671_v2 }
 0x847   :  { %1672 = vtanh.f32 %v630_v0 }
 0x848   :  { %v635_v8 = vmul.f32 %v633_v3, %v619_v5 }
 0x84d   :  { %v1673_v4 = vpop.eup %1672 }
 0x84e   :  { %v634_v7 = vadd.f32 1.0, %v1673_v4  ;;  %v1634_v4 = vld [vmem:[%s2092_s5 + $0xc] ss:$0 sm:$0xff] }
 0x850   :  { %v636_v9 = vmul.f32 %v634_v7, %v620_v6 }
 0x852   :  { %v638_v11 = vpack.c.bf16 %v636_v9, %v635_v8  ;;  %v1635_v8 = vld [vmem:[%s2092_s5 + $0xd] ss:$0 sm:$0xff]  ;;  %v1636_v9 = vld [vmem:[%s2092_s5 + $0xe] ss:$0 sm:$0xff] }
 0x854   :  { %1487 = vmatmul.msk.bf16.vlgmr.msra.gmra.mxu0 %vm664_vm2, %v638_v11 }
 0x8d1   :  { %v677_v13 = vpop.f32.mrf.mxu0 }
 0x8d2   :  { %v678_v14 = vadd.f32 %v1631_v12, %v677_v13 }
 0x8d4   :  { %v682_v15 = vadd.f32 %v678_v14, %v585_v42 }
 0x8d6   :  { %v686_v16 = vsel %vm31_vm0, %v682_v15, 0.0 }
 0x8d7   :  { %687 = vadd.xlane.f32.xlu2 %v686_v16 }
 0x8d9   :  { %v679_v54 = vpop.f32.mrf.mxu0 }
 0x8da   :  { %v680_v17 = vadd.f32 %v1631_v12, %v679_v54 }
 0x8dc   :  { %v683_v18 = vadd.f32 %v680_v17, %v586_v43 }
 0x8de   :  { %v689_v19 = vsel %vm31_vm0, %v683_v18, 0.0 }
 0x8df   :  { %690 = vadd.xlane.f32.xlu0 %v689_v19 }
 0x94a   :  { %v688_v20 = vpop.xlane.xlu2 %687 }
 0x94b   :  { %v692_v21 = vmul.f32 %v688_v20, %v1778_v10 }
 0x94d   :  { %v694_v22 = vsub.f32 %v682_v15, %v692_v21 }
 0x94f   :  { %v696_v23 = vmul.f32 %v694_v22, %v694_v22 }
 0x951   :  { %v698_v24 = vsel %vm31_vm0, %v696_v23, 0.0 }
 0x952   :  { %v691_v25 = vpop.xlane.xlu0 %690  ;;  %699 = vadd.xlane.f32.xlu1 %v698_v24 }
 0x953   :  { %v693_v26 = vmul.f32 %v691_v25, %v1778_v10 }
 0x955   :  { %v695_v27 = vsub.f32 %v683_v18, %v693_v26 }
 0x957   :  { %v697_v28 = vmul.f32 %v695_v27, %v695_v27 }
 0x959   :  { %v701_v30 = vsel %vm31_vm0, %v697_v28, 0.0 }
 0x95a   :  { %702 = vadd.xlane.f32.xlu2 %v701_v30 }
 0x9c5   :  { %v700_v34 = vpop.xlane.xlu1 %699 }
 0x9c6   :  { %v704_v35 = vmul.f32 %v700_v34, %v1778_v10 }
 0x9c8   :  { %v706_v36 = vadd.f32 1e-12, %v704_v35  ;;  %v1610_v35 = vld [vmem:[%s2089_s2 + $0x78] sm:$0xff] }
 0x9ca   :  { %1674 = vrsqrt.f32 %v706_v36  ;;  %vm714_vm4 = vweird.f32 %v706_v36 }
 0x9cd   :  { %v703_v40 = vpop.xlane.xlu2 %702 }
 0x9ce   :  { %v705_v41 = vmul.f32 %v703_v40, %v1778_v10 }
 0x9d0   :  { %v1675_v42 = vpop.eup %1674  ;;  %v707_v43 = vadd.f32 1e-12, %v705_v41 }
 0x9d1   :  { %v709_v44 = vmul.f32 %v1675_v42, %v706_v36  ;;  %vm715_vm3 = vweird.f32 %v1675_v42 }
 0x9d2   :  { %1676 = vrsqrt.f32 %v707_v43  ;;  %vm716_vm5 = vmor %vm714_vm4, %vm715_vm3  ;;  %vm724_vm7 = vweird.f32 %v707_v43 }
 0x9d3   :  { %v710_v45 = vmul.f32 %v1675_v42, %v709_v44 }
 0x9d5   :  { %v711_v46 = vmul.f32 0.5, %v710_v45 }
 0x9d7   :  { %v712_v47 = vsub.f32 1.5, %v711_v46 }
 0x9d8   :  { %v1677_v48 = vpop.eup %1676 }
 0x9d9   :  { %v713_v49 = vmul.f32 %v1675_v42, %v712_v47  ;;  %v719_v50 = vmul.f32 %v1677_v48, %v707_v43  ;;  %vm725_vm6 = vweird.f32 %v1677_v48 }
 0x9da   :  { %vm726_vm11 = vmor %vm724_vm7, %vm725_vm6  ;;  %vm1385_vm6 = vcmask 254976  }
 0x9db   :  { %v720_v51 = vmul.f32 %v1677_v48, %v719_v50  ;;  %v717_v52 = vsel %vm716_vm5, %v1675_v42, %v713_v49  ;;  %vm1383_vm5 = vcmask 1040384  }
 0x9dc   :  { %v728_v57 = vmul.f32 %v717_v52, %v694_v22 }
 0x9dd   :  { %v721_v55 = vmul.f32 0.5, %v720_v51 }
 0x9de   :  { %v731_v61 = vmul.f32 %v1632_v53, %v728_v57 }
 0x9df   :  { %v722_v56 = vsub.f32 1.5, %v721_v55 }
 0x9e0   :  { %v1959_v0 = vadd.f32 %v1633_v60, %v731_v61 }
 0x9e1   :  { %v723_v58 = vmul.f32 %v1677_v48, %v722_v56 }
 0x9e3   :  { %v727_v59 = vsel %vm726_vm11, %v1677_v48, %v723_v58 }
 0x9e4   :  { %v729_v62 = vmul.f32 %v727_v59, %v695_v27 }
 0x9e6   :  { %v732_v63 = vmul.f32 %v1632_v53, %v729_v62 }
 0x9e8   :  { %v1961_v2 = vadd.f32 %v1633_v60, %v732_v63 }
 0x9ea   :  { %v771_v3 = vpack.c.bf16 %v1961_v2, %v1959_v0 }
 0x9ec   :  { %1524 = vmatmul.msk.bf16.vlgmr.msra.gmra.mxu1 %vm31_vm0, %v771_v3  ;;  %1533 = vmatmul.msk.bf16.vlgmr.msra.gmra.mxu2 %vm31_vm0, %v771_v3 }
 0x9ed   :  { %1542 = vmatmul.msk.bf16.vlgmr.msra.gmra.mxu3 %vm31_vm0, %v771_v3 }
 0xa69   :  { %v797_v5 = vpop.f32.mrf.mxu1 }
 0xa6a   :  { %v798_v6 = vadd.f32 %v1634_v4, %v797_v5 }
 0xa6c   :  { %v858_v7 = vpack.c.bf16 %v798_v6, %v798_v6 }
 0xa6e   :  { %v916_v11 = vunpack.c.l.b16 %v858_v7 }
 0xa6f   :  { %v825_v12 = vpop.f32.mrf.mxu2 }
 0xa70   :  { %v917_v13 = vpack.c.b16 %v916_v11, %v916_v11  ;;  %v826_v14 = vadd.f32 %v1635_v8, %v825_v12  ;;  %v853_v15 = vpop.f32.mrf.mxu3 }
 0xa71   :  { %v854_v16 = vadd.f32 %v1636_v9, %v853_v15  ;;  %v799_v25 = vpop.f32.mrf.mxu1 }
 0xa72   :  { %v860_v54 = vpack.c.bf16 %v826_v14, %v826_v14  ;;  %918 = vrot.lane.b32.xlu2 %v917_v13, %s1733_s22  ;;  %v800_v28 = vadd.f32 %v1634_v4, %v799_v25  ;;  %v1609_v25 = vld [vmem:[%s2089_s2 + $0x70] sm:$0xff] }
 0xa73   :  { %v862_v17 = vpack.c.bf16 %v854_v16, %v854_v16 }
 0xa74   :  { %v868_v18 = vsel %vm215_vm8, %v860_v54, 0  ;;  %v921_v19 = vunpack.c.l.b16 %v860_v54  ;;  %v859_v32 = vpack.c.bf16 %v800_v28, %v800_v28 }
 0xa75   :  { %v899_v20 = vsel %vm251_vm9, %v862_v17, 0  ;;  %v957_v21 = vunpack.c.l.b16 %v862_v17  ;;  %877 = vmatpush.bf16.xpose.msrb.mxu0 %v868_v18 }
 0xa76   :  { %v922_v22 = vpack.c.b16 %v921_v19, %v921_v19  ;;  %908 = vmatpush.bf16.msrb.mxu1 %v899_v20  ;;  %v1077_v33 = vunpack.c.l.b16 %v859_v32 }
 0xa77   :  { %v958_v23 = vpack.c.b16 %v957_v21, %v957_v21  ;;  %v827_v24 = vpop.f32.mrf.mxu2 }
 0xa78   :  { %v828_v26 = vadd.f32 %v1635_v8, %v827_v24  ;;  %923 = vrot.lane.b32.xlu1 %v922_v22, %s1733_s22  ;;  %v1078_v34 = vpack.c.b16 %v1077_v33, %v1077_v33  ;;  %v855_v36 = vpop.f32.mrf.mxu3 }
 0xa79   :  { %959 = vrot.lane.b32.xlu0 %v958_v23, %s1733_s22  ;;  %v856_v37 = vadd.f32 %v1636_v9, %v855_v36 }
 0xa7a   :  { %v861_v27 = vpack.c.bf16 %v828_v26, %v828_v26  ;;  %1019 = vmatpush.bf16.msra.mxu1 %v1609_v25 }
 0xa7b   :  { %v1988_v38 = vpack.c.bf16 %v856_v37, %v856_v37 }
 0xa7c   :  { %v1082_v30 = vunpack.c.l.b16 %v861_v27  ;;  %1543 = vmatmul.msk.bf16.vlgmr.msrb.gmra.mxu0 %vm215_vm8, %v858_v7  ;;  %v1029_v42 = vsel %vm215_vm8, %v861_v27, 0 }
 0xa7d   :  { %997 = vmatpush.bf16.msra.mxu0 %v1610_v35  ;;  %v1060_v44 = vsel %vm251_vm9, %v1988_v38, 0  ;;  %v1118_v23 = vunpack.c.l.b16 %v1988_v38 }
 0xa7e   :  { %v1083_v31 = vpack.c.b16 %v1082_v30, %v1082_v30 }
 0xa7f   :  { %v1119_v24 = vpack.c.b16 %v1118_v23, %v1118_v23 }
 0xa81   :  { %1084 = vrot.lane.b32.xlu0 %v1083_v31, %s1733_s22 }
 0xa89   :  { %1079 = vrot.lane.b32.xlu0 %v1078_v34, %s1733_s22 }
 0xacc   :  { %v919_v45 = vpop.permute.xlu2 %918 }
 0xaea   :  { %v924_v39 = vpop.permute.xlu1 %923 }
 0xaeb   :  { %v960_v40 = vpop.permute.xlu0 %959  ;;  %v929_v41 = vsel %vm215_vm8, %v924_v39, 0 }
 0xaec   :  { %v965_v43 = vsel %vm251_vm9, %v960_v40, 0  ;;  %938 = vmatpush.bf16.xpose.msrb.mxu2 %v929_v41 }
 0xaed   :  { %974 = vmatpush.bf16.msrb.mxu3 %v965_v43 }
 0xaf1   :  { %1069 = vmatpush.bf16.msra.mxu3 %v1060_v44 }
 0xaf3   :  { %v1085_v46 = vpop.permute.xlu0 %1084  ;;  %1545 = vmatmul.msk.bf16.vlgmr.msrb.gmra.mxu2 %vm215_vm8, %v919_v45 }
 0xaf4   :  { %1038 = vmatpush.bf16.xpose.msra.mxu2 %v1029_v42  ;;  %v1090_v47 = vsel %vm215_vm8, %v1085_v46, 0 }
 0xaf5   :  { %1099 = vmatpush.bf16.xpose.msrb.mxu0 %v1090_v47 }
 0xaf9   :  { %v879_v48 = vpop.f32.mrf.mxu0 }
 0xafa   :  { %v880_v55 = vadd.f32 %v1843_v29, %v879_v48 }
 0xafb   :  { %v1080_v9 = vpop.permute.xlu0 %1079 }
 0xafc   :  { %1152 = vmatpush.bf16.msrb.mxu2 %v1610_v35  ;;  %v883_v53 = vsel %vm235_vm10, %v880_v55, -inf }
 0xb01   :  { %v881_v49 = vpop.f32.mrf.mxu0 }
 0xb03   :  { %1557 = vmatmul.msk.bf16.vlgmr.msra.gmra.mxu2 %vm215_vm8, %v859_v32 }
 0xb76   :  { %v940_v50 = vpop.f32.mrf.mxu2 }
 0xb77   :  { %v941_v51 = vadd.f32 %v1843_v29, %v940_v50 }
 0xb79   :  { %v944_v52 = vsel %vm235_vm10, %v941_v51, -inf }
 0xb7a   :  { %945 = vmax.xlane.f32.xlu1 %v944_v52 }
 0xb7e   :  { %v942_v56 = vpop.f32.mrf.mxu2 }
 0xb82   :  { %884 = vmax.xlane.f32.xlu1 %v883_v53  ;;  %v1637_v53 = vld [vmem:[%s2092_s5 + $0xf] ss:$0 sm:$0xff] }
 0xb86   :  { %v1040_v57 = vpop.f32.mrf.mxu2 }
 0xb87   :  { %v1041_v29 = vadd.f32 %v1864_v1, %v1040_v57 }
 0xb89   :  { %v1044_v7 = vsel %vm235_vm10, %v1041_v29, -inf }
 0xb8e   :  { %v1042_v58 = vpop.f32.mrf.mxu2 }
 0xbed   :  { %v946_v59 = vpop.xlane.xlu1 %945 }
 0xbee   :  { %v947_v60 = vsub.f32 %v941_v51, %v946_v59 }
 0xbf0   :  { %v948_v61 = vmul.f32 1.442695, %v947_v60 }
 0xbf2   :  { %1678 = vpow2.f32 %v948_v61 }
 0xbf5   :  { %v885_v62 = vpop.xlane.xlu1 %884 }
 0xbf6   :  { %v886_v63 = vsub.f32 %v880_v55, %v885_v62 }
 0xbf8   :  { %v1679_v3 = vpop.eup %1678  ;;  %v887_v4 = vmul.f32 1.442695, %v886_v63 }
 0xbf9   :  { %v950_v5 = vsel %vm235_vm10, %v1679_v3, 0.0 }
 0xbfa   :  { %1680 = vpow2.f32 %v887_v4  ;;  %951 = vadd.xlane.f32.xlu2 %v950_v5 }
 0xc00   :  { %v1681_v6 = vpop.eup %1680 }
 0xc01   :  { %v889_v8 = vsel %vm235_vm10, %v1681_v6, 0.0 }
 0xc02   :  { %1045 = vmax.xlane.f32.xlu2 %v1044_v7  ;;  %890 = vadd.xlane.f32.xlu0 %v889_v8 }
 0xc6d   :  { %v952_v11 = vpop.xlane.xlu2 %951 }
 0xc6e   :  { %1682 = vrcp.f32 %v952_v11 }
 0xc74   :  { %v1683_v12 = vpop.eup %1682 }
 0xc75   :  { %v954_v13 = vmul.f32 %v1683_v12, %v1679_v3  ;;  %v1046_v14 = vpop.xlane.xlu2 %1045  ;;  %v891_v15 = vpop.xlane.xlu0 %890 }
 0xc76   :  { %v1047_v16 = vsub.f32 %v1041_v29, %v1046_v14  ;;  %1684 = vrcp.f32 %v891_v15 }
 0xc77   :  { %v955_v54 = vpack.c.bf16 %v954_v13, %v954_v13 }
 0xc78   :  { %v1048_v17 = vmul.f32 1.442695, %v1047_v16 }
 0xc79   :  { %1546 = vmatmul.msk.bf16.vlgmr.msrb.gmra.mxu3 %vm235_vm10, %v955_v54 }
 0xc7a   :  { %1686 = vpow2.f32 %v1048_v17  ;;  %1168 = vmatpush.bf16.msrb.mxu3 %v1609_v25 }
 0xc7c   :  { %v1685_v18 = vpop.eup %1684 }
 0xc7d   :  { %v893_v19 = vmul.f32 %v1685_v18, %v1681_v6 }
 0xc7f   :  { %v894_v20 = vpack.c.bf16 %v893_v19, %v893_v19 }
 0xc80   :  { %v1687_v21 = vpop.eup %1686 }
 0xc81   :  { %1544 = vmatmul.msk.bf16.vlgmr.msrb.gmra.mxu1 %vm235_vm10, %v894_v20  ;;  %v1050_v22 = vsel %vm235_vm10, %v1687_v21, 0.0 }
 0xc82   :  { %1051 = vadd.xlane.f32.xlu2 %v1050_v22 }
 0xc9a   :  { %1120 = vrot.lane.b32.xlu2 %v1119_v24, %s1733_s22  ;;  %v1612_v24 = vld [vmem:[%s2090_s3 + $0x18] sm:$0xff]  ;;  %s1394_s22 = sshll.u32 %s2093_s6, 4  ;;  %s1395_s22 = int_to_ptr.hbm [resolvable:$true] %s1394_s22 }
 0xcf5   :  { %v1052_v26 = vpop.xlane.xlu2 %1051 }
 0xcf6   :  { %1688 = vrcp.f32 %v1052_v26  ;;  %v1611_v26 = vld [vmem:[%s2090_s3 + $0x10] sm:$0xff] }
 0xcfc   :  { %v1689_v27 = vpop.eup %1688  ;;  %v976_v28 = vpop.f32.mrf.mxu3 }
 0xcfd   :  { %v1054_v30 = vmul.f32 %v1689_v27, %v1687_v21  ;;  %v980_v31 = vpack.c.bf16 %v976_v28, %v976_v28  ;;  %v1121_v32 = vpop.permute.xlu2 %1120 }
 0xcfe   :  { %v1126_v33 = vsel %vm251_vm9, %v1121_v32, 0  ;;  %v910_v34 = vpop.f32.mrf.mxu1 }
 0xcff   :  { %v1055_v35 = vpack.c.bf16 %v1054_v30, %v1054_v30  ;;  %v914_v36 = vpack.c.bf16 %v910_v34, %v910_v34  ;;  %1551 = vmatmul.msk.bf16.vlgmr.msra.gmra.mxu0 %vm215_vm8, %v980_v31  ;;  %1135 = vmatpush.bf16.msrb.mxu1 %v1126_v33 }
 0xd00   :  { %1256 = vmatpush.bf16.msra.mxu0 %v1612_v24 }
 0xd01   :  { %1556 = vmatmul.msk.bf16.vlgmr.msra.gmra.mxu1 %vm215_vm8, %v914_v36  ;;  %1558 = vmatmul.msk.bf16.vlgmr.msra.gmra.mxu3 %vm235_vm10, %v1055_v35 }
 0xd04   :  { %v978_v37 = vpop.f32.mrf.mxu3  ;;  %1257 = vmatpush.bf16.msra.mxu0 %v1611_v26 }
 0xd06   :  { %v912_v38 = vpop.f32.mrf.mxu1 }
 0xd0f   :  { %1559 = vmatmul.msk.bf16.vlgmr.msrb.gmra.mxu0 %vm215_vm8, %v1080_v9 }
 0xd7c   :  { %v999_v39 = vpop.f32.mrf.mxu0 }
 0xd7e   :  { %v1021_v40 = vpop.f32.mrf.mxu1 }
 0xd7f   :  { %v1022_v41 = vadd.f32 %v1021_v40, %v999_v39 }
 0xd81   :  { %v1176_v58 = vadd.f32 %v1637_v53, %v1022_v41 }
 0xd84   :  { %v1001_v42 = vpop.f32.mrf.mxu0  ;;  %v1071_v43 = vpop.f32.mrf.mxu3 }
 0xd85   :  { %v1075_v44 = vpack.c.bf16 %v1071_v43, %v1071_v43  ;;  %v1638_v42 = vld [vmem:[%s2092_s5 + $0x12] ss:$0 sm:$0xff] }
 0xd86   :  { %v1023_v45 = vpop.f32.mrf.mxu1 }
 0xd87   :  { %1562 = vmatmul.msk.bf16.vlgmr.msrb.gmra.mxu3 %vm215_vm8, %v1075_v44 }
 0xd8c   :  { %v1073_v46 = vpop.f32.mrf.mxu3  ;;  %v1101_v47 = vpop.f32.mrf.mxu0 }
 0xd8d   :  { %v1102_v48 = vadd.f32 %v1864_v1, %v1101_v47  ;;  %v1178_v1 = vadd.f32 %v1176_v58, %v1959_v0  ;;  %v1639_v46 = vld [vmem:[%s2092_s5 + $0x13] ss:$0 sm:$0xff]  ;;  %v1640_v58 = vld [vmem:[%s2092_s5 + $0x10] ss:$0 sm:$0xff] }
 0xd8f   :  { %v1105_v49 = vsel %vm235_vm10, %v1102_v48, -inf  ;;  %v1182_v61 = vsel %vm31_vm0, %v1178_v1, 0.0 }
 0xd90   :  { %1106 = vmax.xlane.f32.xlu1 %v1105_v49 }
 0xd94   :  { %v1103_v50 = vpop.f32.mrf.mxu0 }
 0xe03   :  { %v1107_v51 = vpop.xlane.xlu1 %1106 }
 0xe04   :  { %v1108_v52 = vsub.f32 %v1102_v48, %v1107_v51 }
 0xe06   :  { %v1109_v55 = vmul.f32 1.442695, %v1108_v52 }
 0xe08   :  { %1690 = vpow2.f32 %v1109_v55  ;;  %v1616_v55 = vld [vmem:[%s2091_s4 + $0x38] sm:$0xff] }
 0xe09   :  { %1316 = vmatpush.bf16.msra.mxu1 %v1616_v55 }
 0xe0a   :  { %v1170_v56 = vpop.f32.mrf.mxu3 }
 0xe0e   :  { %v1691_v57 = vpop.eup %1690 }
 0xe0f   :  { %v1111_v59 = vsel %vm235_vm10, %v1691_v57, 0.0 }
 0xe10   :  { %1112 = vadd.xlane.f32.xlu1 %v1111_v59 }
 0xe12   :  { %v1172_v60 = vpop.f32.mrf.mxu3 }
 0xe18   :  { %1183 = vadd.xlane.f32.xlu1 %v1182_v61 }
 0xe83   :  { %v1113_v62 = vpop.xlane.xlu1 %1112 }
 0xe84   :  { %1692 = vrcp.f32 %v1113_v62 }
 0xe8a   :  { %v1693_v63 = vpop.eup %1692 }
 0xe8b   :  { %v1115_v3 = vmul.f32 %v1693_v63, %v1691_v57  ;;  %v1184_v7 = vpop.xlane.xlu1 %1183  ;;  %v1613_v57 = vld [vmem:[%s2091_s4 + $0x20] sm:$0xff] }
 0xe8c   :  { %v1188_v0 = vmul.f32 %v1184_v7, %v1778_v10 }
 0xe8d   :  { %v1116_v4 = vpack.c.bf16 %v1115_v3, %v1115_v3 }
 0xe8e   :  { %v1190_v13 = vsub.f32 %v1178_v1, %v1188_v0 }
 0xe8f   :  { %1560 = vmatmul.msk.bf16.vlgmr.msrb.gmra.mxu1 %vm235_vm10, %v1116_v4 }
 0xe90   :  { %v1192_v16 = vmul.f32 %v1190_v13, %v1190_v13 }
 0xe92   :  { %v1194_v54 = vsel %vm31_vm0, %v1192_v16, 0.0 }
 0xf0c   :  { %v1137_v5 = vpop.f32.mrf.mxu1 }
 0xf0d   :  { %v1141_v29 = vpack.c.bf16 %v1137_v5, %v1137_v5 }
 0xf0f   :  { %1561 = vmatmul.msk.bf16.vlgmr.msrb.gmra.mxu2 %vm215_vm8, %v1141_v29 }
 0xf14   :  { %v1139_v6 = vpop.f32.mrf.mxu1 }
 0xf92   :  { %v1154_v8 = vpop.f32.mrf.mxu2 }
 0xf93   :  { %v1171_v9 = vadd.f32 %v1170_v56, %v1154_v8  ;;  %v1615_v56 = vld [vmem:[%s2091_s4 + $0x30] sm:$0xff] }
 0xf94   :  { %1317 = vmatpush.bf16.msra.mxu1 %v1615_v56 }
 0xf95   :  { %v1177_v11 = vadd.f32 %v1637_v53, %v1171_v9  ;;  %v1614_v53 = vld [vmem:[%s2091_s4 + $0x28] sm:$0xff] }
 0xf97   :  { %v1179_v12 = vadd.f32 %v1177_v11, %v1961_v2 }
 0xf98   :  { %1318 = vmatpush.bf16.msra.mxu1 %v1614_v53 }
 0xf99   :  { %v1185_v14 = vsel %vm31_vm0, %v1179_v12, 0.0 }
 0xf9a   :  { %1186 = vadd.xlane.f32.xlu1 %v1185_v14  ;;  %v1156_v15 = vpop.f32.mrf.mxu2 }
 0xf9c   :  { %1319 = vmatpush.bf16.msra.mxu1 %v1613_v57  ;;  %v1642_v57 = vld [vmem:[%s2092_s5 + $0x14] ss:$0 sm:$0xff] }
 0xfa2   :  { %1195 = vadd.xlane.f32.xlu1 %v1194_v54 }
0x100d   :  { %v1187_v17 = vpop.xlane.xlu1 %1186 }
0x100e   :  { %v1189_v18 = vmul.f32 %v1187_v17, %v1778_v10 }
0x1010   :  { %v1191_v19 = vsub.f32 %v1179_v12, %v1189_v18  ;;  %v1641_v18 = vld [vmem:[%s2092_s5 + $0x11] ss:$0 sm:$0xff] }
0x1012   :  { %v1193_v20 = vmul.f32 %v1191_v19, %v1191_v19 }
0x1014   :  { %v1197_v21 = vsel %vm31_vm0, %v1193_v20, 0.0 }
0x1015   :  { %1198 = vadd.xlane.f32.xlu0 %v1197_v21  ;;  %v1196_v22 = vpop.xlane.xlu1 %1195 }
0x1016   :  { %v1200_v2 = vmul.f32 %v1196_v22, %v1778_v10 }
0x1018   :  { %v1202_v23 = vadd.f32 1e-12, %v1200_v2 }
0x101a   :  { %1694 = vrsqrt.f32 %v1202_v23  ;;  %vm1210_vm9 = vweird.f32 %v1202_v23 }
0x1020   :  { %v1695_v25 = vpop.eup %1694 }
0x1021   :  { %v1205_v27 = vmul.f32 %v1695_v25, %v1202_v23  ;;  %vm1211_vm8 = vweird.f32 %v1695_v25 }
0x1022   :  { %vm1212_vm10 = vmor %vm1210_vm9, %vm1211_vm8 }
0x1023   :  { %v1206_v28 = vmul.f32 %v1695_v25, %v1205_v27 }
0x1025   :  { %v1207_v33 = vmul.f32 0.5, %v1206_v28 }
0x1027   :  { %v1208_v34 = vsub.f32 1.5, %v1207_v33 }
0x1029   :  { %v1209_v36 = vmul.f32 %v1695_v25, %v1208_v34 }
0x102b   :  { %v1213_v39 = vsel %vm1212_vm10, %v1695_v25, %v1209_v36 }
0x102c   :  { %v1224_v43 = vmul.f32 %v1213_v39, %v1190_v13 }
0x102e   :  { %v1227_v47 = vmul.f32 %v1638_v42, %v1224_v43 }
0x1030   :  { %v1230_v50 = vadd.f32 %v1639_v46, %v1227_v47 }
0x1088   :  { %v1199_v30 = vpop.xlane.xlu0 %1198 }
0x1089   :  { %v1201_v31 = vmul.f32 %v1199_v30, %v1778_v10 }
0x108b   :  { %v1203_v32 = vadd.f32 1e-12, %v1201_v31 }
0x108d   :  { %1696 = vrsqrt.f32 %v1203_v32  ;;  %vm1220_vm13 = vweird.f32 %v1203_v32 }
0x1093   :  { %v1697_v35 = vpop.eup %1696 }
0x1094   :  { %v1215_v37 = vmul.f32 %v1697_v35, %v1203_v32  ;;  %vm1221_vm12 = vweird.f32 %v1697_v35 }
0x1095   :  { %vm1222_vm14 = vmor %vm1220_vm13, %vm1221_vm12 }
0x1096   :  { %v1216_v38 = vmul.f32 %v1697_v35, %v1215_v37 }
0x1098   :  { %v1217_v40 = vmul.f32 0.5, %v1216_v38 }
0x109a   :  { %v1218_v41 = vsub.f32 1.5, %v1217_v40 }
0x109c   :  { %v1219_v44 = vmul.f32 %v1697_v35, %v1218_v41 }
0x109e   :  { %v1223_v45 = vsel %vm1222_vm14, %v1697_v35, %v1219_v44 }
0x109f   :  { %v1225_v48 = vmul.f32 %v1223_v45, %v1191_v19 }
0x10a1   :  { %v1228_v49 = vmul.f32 %v1638_v42, %v1225_v48 }
0x10a3   :  { %v1231_v51 = vadd.f32 %v1639_v46, %v1228_v49 }
0x10a5   :  { %v1233_v52 = vpack.c.bf16 %v1231_v51, %v1230_v50 }
0x10a7   :  { %1571 = vmatmul.msk.bf16.vlgmr.msra.gmra.mxu0 %vm31_vm0, %v1233_v52 }
0x1124   :  { %v1259_v59 = vpop.f32.mrf.mxu0 }
0x1125   :  { %v1260_v60 = vadd.f32 %v1640_v58, %v1259_v59 }
0x1127   :  { %v1266_v1 = vmul.f32 0.044715, %v1260_v60  ;;  %v1264_v13 = vmul.f32 0.5, %v1260_v60 }
0x1129   :  { %v1268_v61 = vmul.f32 %v1266_v1, %v1260_v60 }
0x112b   :  { %v1270_v62 = vmul.f32 %v1268_v61, %v1260_v60  ;;  %v1643_v61 = vld [vmem:[%s2092_s5 + $0x15] ss:$0 sm:$0xff] }
0x112c   :  { %v1261_v63 = vpop.f32.mrf.mxu0 }
0x112d   :  { %v1272_v3 = vadd.f32 %v1270_v62, %v1260_v60  ;;  %v1262_v4 = vadd.f32 %v1640_v58, %v1261_v63 }
0x112f   :  { %v1267_v5 = vmul.f32 0.044715, %v1262_v4  ;;  %v1274_v29 = vmul.f32 0.7978846, %v1272_v3  ;;  %v1265_v14 = vmul.f32 0.5, %v1262_v4 }
0x1131   :  { %v1269_v6 = vmul.f32 %v1267_v5, %v1262_v4  ;;  %1698 = vtanh.f32 %v1274_v29 }
0x1133   :  { %v1271_v7 = vmul.f32 %v1269_v6, %v1262_v4 }
0x1135   :  { %v1273_v8 = vadd.f32 %v1271_v7, %v1262_v4 }
0x1137   :  { %v1275_v9 = vmul.f32 0.7978846, %v1273_v8  ;;  %v1699_v0 = vpop.eup %1698 }
0x1138   :  { %v1278_v11 = vadd.f32 1.0, %v1699_v0 }
0x1139   :  { %1700 = vtanh.f32 %v1275_v9 }
0x113a   :  { %v1280_v16 = vmul.f32 %v1278_v11, %v1264_v13 }
0x113f   :  { %v1701_v12 = vpop.eup %1700 }
0x1140   :  { %v1279_v15 = vadd.f32 1.0, %v1701_v12 }
0x1142   :  { %v1281_v54 = vmul.f32 %v1279_v15, %v1265_v14 }
0x1144   :  { %v1283_v17 = vpack.c.bf16 %v1281_v54, %v1280_v16 }
0x1146   :  { %1588 = vmatmul.msk.bf16.vlgmr.msra.gmra.mxu1 %vm664_vm2, %v1283_v17 }
0x11c3   :  { %v1321_v19 = vpop.f32.mrf.mxu1 }
0x11c4   :  { %v1322_v20 = vadd.f32 %v1641_v18, %v1321_v19 }
0x11c6   :  { %v1326_v21 = vadd.f32 %v1322_v20, %v1230_v50 }
0x11c8   :  { %v1330_v22 = vsel %vm31_vm0, %v1326_v21, 0.0 }
0x11c9   :  { %1331 = vadd.xlane.f32.xlu1 %v1330_v22 }
0x11cb   :  { %v1323_v2 = vpop.f32.mrf.mxu1 }
0x11cc   :  { %v1324_v23 = vadd.f32 %v1641_v18, %v1323_v2 }
0x11ce   :  { %v1327_v24 = vadd.f32 %v1324_v23, %v1231_v51 }
0x11d0   :  { %v1333_v25 = vsel %vm31_vm0, %v1327_v24, 0.0 }
0x11d1   :  { %1334 = vadd.xlane.f32.xlu2 %v1333_v25 }
0x123c   :  { %v1332_v26 = vpop.xlane.xlu1 %1331 }
0x123d   :  { %v1336_v27 = vmul.f32 %v1332_v26, %v1778_v10 }
0x123f   :  { %v1338_v28 = vsub.f32 %v1326_v21, %v1336_v27 }
0x1241   :  { %v1340_v30 = vmul.f32 %v1338_v28, %v1338_v28 }
0x1243   :  { %v1342_v31 = vsel %vm31_vm0, %v1340_v30, 0.0 }
0x1244   :  { %v1335_v32 = vpop.xlane.xlu2 %1334  ;;  %1343 = vadd.xlane.f32.xlu1 %v1342_v31 }
0x1245   :  { %v1337_v33 = vmul.f32 %v1335_v32, %v1778_v10 }
0x1247   :  { %v1339_v34 = vsub.f32 %v1327_v24, %v1337_v33 }
0x1249   :  { %v1341_v35 = vmul.f32 %v1339_v34, %v1339_v34 }
0x124b   :  { %v1345_v36 = vsel %vm31_vm0, %v1341_v35, 0.0 }
0x124c   :  { %1346 = vadd.xlane.f32.xlu0 %v1345_v36 }
0x12b7   :  { %v1344_v37 = vpop.xlane.xlu1 %1343 }
0x12b8   :  { %v1348_v38 = vmul.f32 %v1344_v37, %v1778_v10 }
0x12ba   :  { %v1350_v39 = vadd.f32 1e-12, %v1348_v38 }
0x12bc   :  { %1702 = vrsqrt.f32 %v1350_v39  ;;  %vm1358_vm15 = vweird.f32 %v1350_v39 }
0x12bf   :  { %v1347_v40 = vpop.xlane.xlu0 %1346 }
0x12c0   :  { %v1349_v41 = vmul.f32 %v1347_v40, %v1778_v10 }
0x12c2   :  { %v1703_v42 = vpop.eup %1702  ;;  %v1351_v43 = vadd.f32 1e-12, %v1349_v41 }
0x12c3   :  { %v1353_v44 = vmul.f32 %v1703_v42, %v1350_v39  ;;  %vm1359_vm0 = vweird.f32 %v1703_v42 }
0x12c4   :  { %1704 = vrsqrt.f32 %v1351_v43  ;;  %vm1360_vm1 = vmor %vm1358_vm15, %vm1359_vm0  ;;  %vm1368_vm3 = vweird.f32 %v1351_v43 }
0x12c5   :  { %v1354_v45 = vmul.f32 %v1703_v42, %v1353_v44 }
0x12c7   :  { %v1355_v46 = vmul.f32 0.5, %v1354_v45 }
0x12c9   :  { %v1356_v47 = vsub.f32 1.5, %v1355_v46 }
0x12ca   :  { %v1705_v48 = vpop.eup %1704 }
0x12cb   :  { %v1363_v49 = vmul.f32 %v1705_v48, %v1351_v43  ;;  %v1357_v50 = vmul.f32 %v1703_v42, %v1356_v47  ;;  %vm1369_vm2 = vweird.f32 %v1705_v48 }
0x12cc   :  { %vm1370_vm4 = vmor %vm1368_vm3, %vm1369_vm2 }
0x12cd   :  { %v1364_v51 = vmul.f32 %v1705_v48, %v1363_v49  ;;  %v1361_v55 = vsel %vm1360_vm1, %v1703_v42, %v1357_v50 }
0x12ce   :  { %v1372_v10 = vmul.f32 %v1361_v55, %v1338_v28 }
0x12cf   :  { %v1365_v52 = vmul.f32 0.5, %v1364_v51 }
0x12d0   :  { %v1375_v60 = vmul.f32 %v1642_v57, %v1372_v10 }
0x12d1   :  { %v1366_v56 = vsub.f32 1.5, %v1365_v52 }
0x12d2   :  { %v1378_v63 = vadd.f32 %v1643_v61, %v1375_v60 }
0x12d3   :  { %v1367_v53 = vmul.f32 %v1705_v48, %v1366_v56 }
0x12d5   :  { %v1371_v58 = vsel %vm1370_vm4, %v1705_v48, %v1367_v53 }
0x12d6   :  { %v1373_v59 = vmul.f32 %v1371_v58, %v1339_v34 }
0x12d8   :  { %v1376_v1 = vmul.f32 %v1642_v57, %v1373_v59 }
0x12da   :  { %v1379_v62 = vadd.f32 %v1643_v61, %v1376_v1 }
0x12dc   :  { %v1381_v3 = vrot.slane %v1379_v62, 7 }
0x12de   :  { %v1384_v4 = vsel %vm1383_vm5, %v1378_v63, %v1381_v3 }
0x12df   :  { %1386 = vst.msk [vmem:[#allocation2] sm:$0x3] %vm1385_vm6, %v1384_v4 }
0x12e0   :  { %1397 = dma.vmem_to_hbm [thread:$0]  %s1393_s26, 32, %s1395_s22, [#allocation3]  }
0x12e1   :  { %1730 = dma.done.wait [#allocation3], 32  }
0x12e2   :  { %1731 = vsyncadd [#allocation3], 4294967264 }
0x12e3   :  { %1402 = vsyncpa [#allocation3], 1 }

</bundles_post_ra>
